<compile_context>
chip_gen: v7x
topology: tpu7x:2x2x1
jax: 0.10.0
libtpu: 0.0.40
codegen_flags: <defaults>
</compile_context>

<pallas_src>
import functools

import jax
import jax.numpy as jnp
import numpy as np
from jax.experimental import pallas as pl
from jax.experimental.pallas import tpu as pltpu


def _fused_resblock_kernel(x_ref, w1_ref, b1_ref, w2_ref, b2_ref, o_ref, *, img_rows):
    """out = x + conv2(relu(conv1(relu(x)))) on one packed (B*H, P*W*C) slab.

    x_ref, o_ref  : (1, B*H, PWC)   lane-dense slab (P images on lanes, B on rows)
    w1_ref, w2_ref: (PWC, 3*PWC)    fused block-diag block-Toeplitz conv matrices
    b1_ref, b2_ref: (1, PWC)        per-lane bias (channel bias tiled over W and P)
    """
    x = x_ref[0]                                   # (BH, PWC) f32
    bh, pwc = x.shape
    h = img_rows

    # Row-boundary masks, hoisted once and reused by both convs.  row % H gives
    # each slab row's position inside its image, so the masks handle both the
    # image boundaries inside the slab and the circular roll wrap.
    row = jax.lax.broadcasted_iota(jnp.int32, (bh, pwc), 0)
    not_top = (row % h) != 0                       # contribution from row h-1 valid
    not_bot = (row % h) != (h - 1)                 # contribution from row h+1 valid
    zeros = jnp.zeros((bh, pwc), jnp.float32)

    def conv3x3(a, w_ref, b_ref):
        # One MXU matmul covers all 3 row taps (K = PWC, N = 3*PWC); the taps
        # are recombined with masked sublane rolls of the outputs (XLU + VPU
        # slots, off the MXU critical path).  f32 accumulation; bias folded in.
        pp = jnp.dot(a, w_ref[...], preferred_element_type=jnp.float32)  # (BH, 3*PWC)
        p_up = pp[:, :pwc]             # needs source row h-1
        p_mid = pp[:, pwc:2 * pwc]     # source row h
        p_dn = pp[:, 2 * pwc:]         # needs source row h+1
        acc = jnp.where(not_top, pltpu.roll(p_up, shift=1, axis=0), zeros)
        acc = acc + p_mid
        acc = acc + jnp.where(not_bot, pltpu.roll(p_dn, shift=bh - 1, axis=0), zeros)
        return acc + b_ref[...]

    t = conv3x3(jnp.maximum(x, 0.0), w1_ref, b1_ref)   # conv1(relu(x)); stays in VMEM
    y = conv3x3(jnp.maximum(t, 0.0), w2_ref, b2_ref)   # conv2(relu(t)); dropout(0)=id
    o_ref[0] = (x + y).astype(o_ref.dtype)             # residual add


def _toeplitz_weights(w_hwio, width):
    """(3,3,C,C) HWIO conv kernel -> per-row-tap (3, W*C, W*C) block-Toeplitz.

    T[dh, (w+dw-1)*C + ci, w*C + co] = w[dh, dw, ci, co]; out-of-range source
    columns are dropped, which is exactly zero 'same' padding along W.
    """
    c = w_hwio.shape[2]
    sel = np.zeros((3, width, width), np.float32)
    for dw in range(3):
        for col in range(width):
            src = col + dw - 1
            if 0 <= src < width:
                sel[dw, src, col] = 1.0
    t = jnp.einsum("djw,hdio->hjiwo", jnp.asarray(sel), w_hwio)
    return t.reshape(3, width * c, width * c)


def _packed_conv_matrix(w_hwio, width, channels, pack):
    """Fused conv matrix for `pack` lane-packed images: (P*W*C, 3*P*W*C).

    Block-diagonal over the packed images (no cross-image mixing along lanes);
    the 3 row taps are concatenated along the output dim so the kernel needs a
    single MXU matmul per conv.  Pure wrapper-side layout plumbing.
    """
    wc = width * channels
    t = _toeplitz_weights(w_hwio, width)                       # (3, WC, WC)
    eye = jnp.eye(pack, dtype=t.dtype)
    tb = jnp.einsum("pq,hij->hpiqj", eye, t).reshape(3, pack * wc, pack * wc)
    return jnp.concatenate([tb[0], tb[1], tb[2]], axis=1)      # (PWC, 3*PWC)


def _choose_packing(n, wc, h, lane_target=128, row_target=256):
    """Pick (P images along lanes, B images along rows) for the packed layout."""
    p = min(max(n, 1), max(1, -(-lane_target // wc)))          # reach >= 128 lanes
    groups = -(-n // p)
    b = max(1, min(groups, max(1, row_target // h)))           # big row slabs
    if groups >= 2 and groups // b < 2:
        b = max(1, groups // 2)                                # keep >=2 steps (v7x)
    return p, b


def conv_residual_block(x_nhwc, w1, b1, w2, b2):
    """Pallas implementation of ConvResidualBlock.forward (default config).

    x_nhwc: (N, H, W, C) float32;  w1, w2: (3, 3, C, C) HWIO;  b1, b2: (C,)
    """
    n, h, w, c = x_nhwc.shape
    wc = w * c

    p, b_tile = _choose_packing(n, wc, h)
    groups = -(-n // p)
    g = -(-groups // b_tile)
    n_pad = g * b_tile * p
    pwc = p * wc
    bh = b_tile * h

    # Wrapper-side layout plumbing: pack P images along lanes, B along rows.
    x_slab = x_nhwc.reshape(n, h, wc)
    if n_pad != n:
        x_slab = jnp.concatenate(
            [x_slab, jnp.zeros((n_pad - n, h, wc), x_slab.dtype)], axis=0)
    x_packed = (x_slab.reshape(g, b_tile, p, h, wc)
                .transpose(0, 1, 3, 2, 4)
                .reshape(g, bh, pwc))

    t1 = _packed_conv_matrix(w1, w, c, p)          # (PWC, 3*PWC)
    t2 = _packed_conv_matrix(w2, w, c, p)
    b1l = jnp.tile(b1, p * w).reshape(1, pwc)
    b2l = jnp.tile(b2, p * w).reshape(1, pwc)

    kernel = functools.partial(_fused_resblock_kernel, img_rows=h)

    out_packed = pl.pallas_call(
        kernel,
        out_shape=jax.ShapeDtypeStruct((g, bh, pwc), jnp.float32),
        grid_spec=pltpu.PrefetchScalarGridSpec(
            num_scalar_prefetch=0,
            grid=(g,),
            in_specs=[
                pl.BlockSpec((1, bh, pwc), lambda i: (i, 0, 0)),   # packed x slab
                pl.BlockSpec((pwc, 3 * pwc), lambda i: (0, 0)),    # conv1 matrix
                pl.BlockSpec((1, pwc), lambda i: (0, 0)),          # bias1
                pl.BlockSpec((pwc, 3 * pwc), lambda i: (0, 0)),    # conv2 matrix
                pl.BlockSpec((1, pwc), lambda i: (0, 0)),          # bias2
            ],
            out_specs=pl.BlockSpec((1, bh, pwc), lambda i: (i, 0, 0)),
        ),
        compiler_params=pltpu.CompilerParams(
            dimension_semantics=("parallel",)),                    # megacore batch
    )(x_packed, t1, b1l, t2, b2l)

    out = (out_packed.reshape(g, b_tile, h, p, wc)
           .transpose(0, 1, 3, 2, 4)
           .reshape(n_pad, h, w, c))
    return out[:n]


def ref_forward(x_nhwc, w1, b1, w2, b2):
    """Pure-JAX reference (matches the PyTorch module, NHWC layout)."""
    def conv(a, w, b):
        y = jax.lax.conv_general_dilated(
            a, w, window_strides=(1, 1), padding="SAME",
            dimension_numbers=("NHWC", "HWIO", "NHWC"))
        return y + b.reshape(1, 1, 1, -1)
    t = conv(jax.nn.relu(x_nhwc), w1, b1)
    t = conv(jax.nn.relu(t), w2, b2)
    return x_nhwc + t


if __name__ == "__main__":
    N, C, H, W = 2, 4, 16, 16  # batch, channels, spatial (PyTorch NCHW sizes)

    key = jax.random.PRNGKey(0)
    k1, k2, k3, k4, k5 = jax.random.split(key, 5)

    # Deterministic synthetic parameters (shapes from Conv2d(C, C, 3, padding=1)).
    x_nchw = jax.random.normal(k1, (N, C, H, W), jnp.float32)   # PyTorch-style input
    x = jnp.transpose(x_nchw, (0, 2, 3, 1))                      # NCHW -> NHWC

    fan_in = C * 3 * 3
    bound = 1.0 / (fan_in ** 0.5)
    w1 = jax.random.uniform(k2, (3, 3, C, C), jnp.float32, -bound, bound)
    b1 = jax.random.uniform(k3, (C,), jnp.float32, -bound, bound)
    # zero_initialization=True: last conv weights/bias ~ U(-0.001, 0.001)
    w2 = jax.random.uniform(k4, (3, 3, C, C), jnp.float32, -0.001, 0.001)
    b2 = jax.random.uniform(k5, (C,), jnp.float32, -0.001, 0.001)

    out = jax.jit(conv_residual_block)(x, w1, b1, w2, b2)
    out = jax.block_until_ready(out)

    ref = ref_forward(x, w1, b1, w2, b2)
    assert out.shape == (N, H, W, C)
    np.testing.assert_allclose(np.asarray(out), np.asarray(ref),
                               rtol=1e-4, atol=1e-4)
    print("KERNEL_OK")
</pallas_src>

<mosaic_0001>
module attributes {stable_mosaic.version = 11 : i64} {
  func.func @_fused_resblock_kernel(%arg0: i32, %arg1: memref<1x16x128xf32, #tpu.memory_space<vmem>>, %arg2: memref<128x384xf32, #tpu.memory_space<vmem>>, %arg3: memref<1x128xf32, #tpu.memory_space<vmem>>, %arg4: memref<128x384xf32, #tpu.memory_space<vmem>>, %arg5: memref<1x128xf32, #tpu.memory_space<vmem>>, %arg6: memref<1x16x128xf32, #tpu.memory_space<vmem>>) attributes {dimension_semantics = [#tpu.dimension_semantics<parallel>], iteration_bounds = array<i64: 1>, scalar_prefetch = 0 : i64, scratch_operands = 0 : i64, tpu.core_type = #tpu.core_type<tc>, window_params = [{transform_indices = @transform_0, window_bounds = array<i64: 1, 16, 128>}, {pipeline_mode = #tpu.pipeline_mode<synchronous>, transform_indices = @transform_1, window_bounds = array<i64: 128, 384>}, {pipeline_mode = #tpu.pipeline_mode<synchronous>, transform_indices = @transform_2, window_bounds = array<i64: 1, 128>}, {pipeline_mode = #tpu.pipeline_mode<synchronous>, transform_indices = @transform_3, window_bounds = array<i64: 128, 384>}, {pipeline_mode = #tpu.pipeline_mode<synchronous>, transform_indices = @transform_4, window_bounds = array<i64: 1, 128>}, {transform_indices = @transform_5, window_bounds = array<i64: 1, 16, 128>}]} {
    %c0 = arith.constant 0 : index
    %c0_0 = arith.constant 0 : index
    %c0_1 = arith.constant 0 : index
    %0 = vector.load %arg1[%c0, %c0_0, %c0_1] : memref<1x16x128xf32, #tpu.memory_space<vmem>>, vector<1x16x128xf32>
    %1 = vector.shape_cast %0 : vector<1x16x128xf32> to vector<16x128xf32>
    %2 = tpu.iota {dimensions = array<i32: 0>} : vector<16x128xi32>
    %c16_i32 = arith.constant 16 : i32
    %c0_i32 = arith.constant 0 : i32
    %3 = arith.cmpi eq, %c16_i32, %c0_i32 : i32
    %c1_i32 = arith.constant 1 : i32
    %4 = arith.select %3, %c1_i32, %c16_i32 : i32
    %5 = vector.broadcast %4 : i32 to vector<16x128xi32>
    %6 = arith.remsi %2, %5 : vector<16x128xi32>
    %c0_i32_2 = arith.constant 0 : i32
    %7 = vector.broadcast %c0_i32_2 : i32 to vector<16x128xi32>
    %8 = arith.cmpi ne, %6, %7 : vector<16x128xi32>
    %c0_i32_3 = arith.constant 0 : i32
    %9 = vector.broadcast %c0_i32_3 : i32 to vector<16x128xi32>
    %10 = arith.cmpi slt, %6, %9 : vector<16x128xi32>
    %c0_i32_4 = arith.constant 0 : i32
    %11 = arith.cmpi slt, %4, %c0_i32_4 : i32
    %12 = vector.broadcast %11 : i1 to vector<16x128xi1>
    %13 = vector.broadcast %12 : vector<16x128xi1> to vector<16x128xi1>
    %14 = arith.xori %10, %13 : vector<16x128xi1>
    %15 = arith.andi %14, %8 : vector<16x128xi1>
    %16 = vector.broadcast %4 : i32 to vector<16x128xi32>
    %17 = arith.addi %6, %16 : vector<16x128xi32>
    %18 = arith.select %15, %17, %6 : vector<16x128xi1>, vector<16x128xi32>
    %c0_i32_5 = arith.constant 0 : i32
    %19 = vector.broadcast %c0_i32_5 : i32 to vector<16x128xi32>
    %20 = arith.cmpi ne, %18, %19 : vector<16x128xi32>
    %c16_i32_6 = arith.constant 16 : i32
    %c0_i32_7 = arith.constant 0 : i32
    %21 = arith.cmpi eq, %c16_i32_6, %c0_i32_7 : i32
    %c1_i32_8 = arith.constant 1 : i32
    %22 = arith.select %21, %c1_i32_8, %c16_i32_6 : i32
    %23 = vector.broadcast %22 : i32 to vector<16x128xi32>
    %24 = arith.remsi %2, %23 : vector<16x128xi32>
    %c0_i32_9 = arith.constant 0 : i32
    %25 = vector.broadcast %c0_i32_9 : i32 to vector<16x128xi32>
    %26 = arith.cmpi ne, %24, %25 : vector<16x128xi32>
    %c0_i32_10 = arith.constant 0 : i32
    %27 = vector.broadcast %c0_i32_10 : i32 to vector<16x128xi32>
    %28 = arith.cmpi slt, %24, %27 : vector<16x128xi32>
    %c0_i32_11 = arith.constant 0 : i32
    %29 = arith.cmpi slt, %22, %c0_i32_11 : i32
    %30 = vector.broadcast %29 : i1 to vector<16x128xi1>
    %31 = vector.broadcast %30 : vector<16x128xi1> to vector<16x128xi1>
    %32 = arith.xori %28, %31 : vector<16x128xi1>
    %33 = arith.andi %32, %26 : vector<16x128xi1>
    %34 = vector.broadcast %22 : i32 to vector<16x128xi32>
    %35 = arith.addi %24, %34 : vector<16x128xi32>
    %36 = arith.select %33, %35, %24 : vector<16x128xi1>, vector<16x128xi32>
    %c15_i32 = arith.constant 15 : i32
    %37 = vector.broadcast %c15_i32 : i32 to vector<16x128xi32>
    %38 = arith.cmpi ne, %36, %37 : vector<16x128xi32>
    %cst = arith.constant 0.000000e+00 : f32
    %39 = vector.broadcast %cst : f32 to vector<16x128xf32>
    %cst_12 = arith.constant 0.000000e+00 : f32
    %40 = vector.broadcast %cst_12 : f32 to vector<16x128xf32>
    %41 = arith.maximumf %1, %40 : vector<16x128xf32>
    %c0_13 = arith.constant 0 : index
    %c0_14 = arith.constant 0 : index
    %42 = vector.load %arg2[%c0_13, %c0_14] : memref<128x384xf32, #tpu.memory_space<vmem>>, vector<128x384xf32>
    %cst_15 = arith.constant dense<0.000000e+00> : vector<16x384xf32>
    %43 = tpu.matmul %41, %42, %cst_15 {dimension_numbers = #tpu.dot_dimension_numbers<[1], [0], [0], [1], [0, 0, 1, 1], [], []>} : vector<16x128xf32>, vector<128x384xf32>, vector<16x384xf32> -> vector<16x384xf32>
    %44 = vector.extract_strided_slice %43 {offsets = [0, 0], sizes = [16, 128], strides = [1, 1]} : vector<16x384xf32> to vector<16x128xf32>
    %45 = vector.extract_strided_slice %43 {offsets = [0, 128], sizes = [16, 128], strides = [1, 1]} : vector<16x384xf32> to vector<16x128xf32>
    %46 = vector.extract_strided_slice %43 {offsets = [0, 256], sizes = [16, 128], strides = [1, 1]} : vector<16x384xf32> to vector<16x128xf32>
    %c1_i32_16 = arith.constant 1 : i32
    %47 = tpu.dynamic_rotate %44 by %c1_i32_16 dim 0 : vector<16x128xf32>, i32 -> vector<16x128xf32>
    %48 = arith.select %20, %47, %39 : vector<16x128xi1>, vector<16x128xf32>
    %49 = arith.addf %48, %45 : vector<16x128xf32>
    %c15_i32_17 = arith.constant 15 : i32
    %50 = tpu.dynamic_rotate %46 by %c15_i32_17 dim 0 : vector<16x128xf32>, i32 -> vector<16x128xf32>
    %51 = arith.select %38, %50, %39 : vector<16x128xi1>, vector<16x128xf32>
    %52 = arith.addf %49, %51 : vector<16x128xf32>
    %c0_18 = arith.constant 0 : index
    %c0_19 = arith.constant 0 : index
    %53 = vector.load %arg3[%c0_18, %c0_19] : memref<1x128xf32, #tpu.memory_space<vmem>>, vector<1x128xf32>
    %54 = vector.broadcast %53 : vector<1x128xf32> to vector<16x128xf32>
    %55 = arith.addf %52, %54 : vector<16x128xf32>
    %cst_20 = arith.constant 0.000000e+00 : f32
    %56 = vector.broadcast %cst_20 : f32 to vector<16x128xf32>
    %57 = arith.maximumf %55, %56 : vector<16x128xf32>
    %c0_21 = arith.constant 0 : index
    %c0_22 = arith.constant 0 : index
    %58 = vector.load %arg4[%c0_21, %c0_22] : memref<128x384xf32, #tpu.memory_space<vmem>>, vector<128x384xf32>
    %cst_23 = arith.constant dense<0.000000e+00> : vector<16x384xf32>
    %59 = tpu.matmul %57, %58, %cst_23 {dimension_numbers = #tpu.dot_dimension_numbers<[1], [0], [0], [1], [0, 0, 1, 1], [], []>} : vector<16x128xf32>, vector<128x384xf32>, vector<16x384xf32> -> vector<16x384xf32>
    %60 = vector.extract_strided_slice %59 {offsets = [0, 0], sizes = [16, 128], strides = [1, 1]} : vector<16x384xf32> to vector<16x128xf32>
    %61 = vector.extract_strided_slice %59 {offsets = [0, 128], sizes = [16, 128], strides = [1, 1]} : vector<16x384xf32> to vector<16x128xf32>
    %62 = vector.extract_strided_slice %59 {offsets = [0, 256], sizes = [16, 128], strides = [1, 1]} : vector<16x384xf32> to vector<16x128xf32>
    %c1_i32_24 = arith.constant 1 : i32
    %63 = tpu.dynamic_rotate %60 by %c1_i32_24 dim 0 : vector<16x128xf32>, i32 -> vector<16x128xf32>
    %64 = arith.select %20, %63, %39 : vector<16x128xi1>, vector<16x128xf32>
    %65 = arith.addf %64, %61 : vector<16x128xf32>
    %c15_i32_25 = arith.constant 15 : i32
    %66 = tpu.dynamic_rotate %62 by %c15_i32_25 dim 0 : vector<16x128xf32>, i32 -> vector<16x128xf32>
    %67 = arith.select %38, %66, %39 : vector<16x128xi1>, vector<16x128xf32>
    %68 = arith.addf %65, %67 : vector<16x128xf32>
    %c0_26 = arith.constant 0 : index
    %c0_27 = arith.constant 0 : index
    %69 = vector.load %arg5[%c0_26, %c0_27] : memref<1x128xf32, #tpu.memory_space<vmem>>, vector<1x128xf32>
    %70 = vector.broadcast %69 : vector<1x128xf32> to vector<16x128xf32>
    %71 = arith.addf %68, %70 : vector<16x128xf32>
    %72 = arith.addf %1, %71 : vector<16x128xf32>
    %c0_28 = arith.constant 0 : index
    %c0_29 = arith.constant 0 : index
    %c0_30 = arith.constant 0 : index
    %73 = vector.load %arg6[%c0_28, %c0_29, %c0_30] : memref<1x16x128xf32, #tpu.memory_space<vmem>>, vector<1x16x128xf32>
    %74 = vector.shape_cast %73 : vector<1x16x128xf32> to vector<16x128xf32>
    %75 = vector.shape_cast %72 : vector<16x128xf32> to vector<1x16x128xf32>
    tpu.vector_store %arg6[%c0_28, %c0_29, %c0_30], %75 {strides = array<i32>} : memref<1x16x128xf32, #tpu.memory_space<vmem>>, vector<1x16x128xf32>,
    return
  }
  func.func @transform_0(%arg0: i32) -> (i32, i32, i32) {
    %c0_i32 = arith.constant 0 : i32
    %c0_i32_0 = arith.constant 0 : i32
    %c0_i32_1 = arith.constant 0 : i32
    return %arg0, %c0_i32, %c0_i32_0 : i32, i32, i32
  }
  func.func @transform_1(%arg0: i32) -> (i32, i32) {
    %c0_i32 = arith.constant 0 : i32
    %c0_i32_0 = arith.constant 0 : i32
    %c0_i32_1 = arith.constant 0 : i32
    return %c0_i32, %c0_i32_0 : i32, i32
  }
  func.func @transform_2(%arg0: i32) -> (i32, i32) {
    %c0_i32 = arith.constant 0 : i32
    %c0_i32_0 = arith.constant 0 : i32
    %c0_i32_1 = arith.constant 0 : i32
    return %c0_i32, %c0_i32_0 : i32, i32
  }
  func.func @transform_3(%arg0: i32) -> (i32, i32) {
    %c0_i32 = arith.constant 0 : i32
    %c0_i32_0 = arith.constant 0 : i32
    %c0_i32_1 = arith.constant 0 : i32
    return %c0_i32, %c0_i32_0 : i32, i32
  }
  func.func @transform_4(%arg0: i32) -> (i32, i32) {
    %c0_i32 = arith.constant 0 : i32
    %c0_i32_0 = arith.constant 0 : i32
    %c0_i32_1 = arith.constant 0 : i32
    return %c0_i32, %c0_i32_0 : i32, i32
  }
  func.func @transform_5(%arg0: i32) -> (i32, i32, i32) {
    %c0_i32 = arith.constant 0 : i32
    %c0_i32_0 = arith.constant 0 : i32
    %c0_i32_1 = arith.constant 0 : i32
    return %arg0, %c0_i32, %c0_i32_0 : i32, i32, i32
  }
}

</mosaic_0001>

<bundles_post_ra>
// kernel: squeeze.6
= control target key start
LH: loop header
LB: loop body
LE: loop exit
PB: predicated region body
PF: predicated region fallthrough
CT: control target
= control target key end

     0   :  { %vm642_vm0 = vcmask 1047556   ;;  %s1240_s10 = smov 64   ;;  %vm644_vm1 = vcmask 523264   ;;  %vm789_vm2 = vcmask 1048064   ;;  %s1811_s0 = inlined_call_operand.vmem [shape: f32[1,2,64,2,64], index: 0, kind: input, shape index: {}]   ;;  %s1812_s1 = inlined_call_operand.vmem [shape: f32[128,128], index: 1, kind: output, shape index: {}]  }
   0x1   :  { %v1202_v0 = vld [vmem:[%s1811_s0 + $0xe] sm:$0x3]  ;;  %v1203_v1 = vld [vmem:[%s1811_s0 + $0xc] sm:$0x3]  ;;  %v1204_v2 = vld [vmem:[%s1811_s0 + $0xa] sm:$0x3] }
   0x2   :  { %608 = vst [vmem:[#allocation0 + $0x38] sm:$0x3] %v1202_v0  ;;  %613 = vst [vmem:[#allocation0 + $0x30] sm:$0x3] %v1203_v1  ;;  %v1205_v3 = vld [vmem:[%s1811_s0 + $0x8] sm:$0x3] }
   0x3   :  { %618 = vst [vmem:[#allocation0 + $0x28] sm:$0x3] %v1204_v2  ;;  %v1206_v4 = vld [vmem:[%s1811_s0 + $0x6] sm:$0x3]  ;;  %v1207_v5 = vld [vmem:[%s1811_s0 + $0x4] sm:$0x3] }
   0x4   :  { %623 = vst [vmem:[#allocation0 + $0x20] sm:$0x3] %v1205_v3  ;;  %628 = vst [vmem:[#allocation0 + $0x18] sm:$0x3] %v1206_v4  ;;  %v1208_v6 = vld [vmem:[%s1811_s0 + $0x2] sm:$0x3] }
   0x5   :  { %633 = vst [vmem:[#allocation0 + $0x10] sm:$0x3] %v1207_v5  ;;  %v638_v7 = vld [vmem:[%s1811_s0] sm:$0x3]  ;;  %637 = vst [vmem:[#allocation0 + $0x8] sm:$0x3] %v1208_v6 }
   0x6   :  { %639 = vst [vmem:[#allocation0] sm:$0x3] %v638_v7  ;;  %v1138_v8 = vld [vmem:[%s1811_s0 + $0x8e] sm:$0x3]  ;;  %v1139_v9 = vld [vmem:[%s1811_s0 + $0x8c] sm:$0x3] }
   0x7   :  { %v1140_v10 = vld [vmem:[%s1811_s0 + $0x8a] sm:$0x3]  ;;  %288 = vst [vmem:[#allocation0 + $0x238] sm:$0x3] %v1138_v8  ;;  %293 = vst [vmem:[#allocation0 + $0x230] sm:$0x3] %v1139_v9 }
   0x8   :  { %298 = vst [vmem:[#allocation0 + $0x228] sm:$0x3] %v1140_v10  ;;  %v1141_v11 = vld [vmem:[%s1811_s0 + $0x88] sm:$0x3]  ;;  %v1142_v12 = vld [vmem:[%s1811_s0 + $0x86] sm:$0x3] }
   0x9   :  { %v1143_v13 = vld [vmem:[%s1811_s0 + $0x84] sm:$0x3]  ;;  %303 = vst [vmem:[#allocation0 + $0x220] sm:$0x3] %v1141_v11  ;;  %308 = vst [vmem:[#allocation0 + $0x218] sm:$0x3] %v1142_v12 }
   0xa   :  { %313 = vst [vmem:[#allocation0 + $0x210] sm:$0x3] %v1143_v13  ;;  %v1144_v14 = vld [vmem:[%s1811_s0 + $0x82] sm:$0x3]  ;;  %v1145_v15 = vld [vmem:[%s1811_s0 + $0x80] sm:$0x3] }
   0xb   :  { %v1170_v16 = vld [vmem:[%s1811_s0 + $0x4e] sm:$0x3]  ;;  %318 = vst [vmem:[#allocation0 + $0x208] sm:$0x3] %v1144_v14  ;;  %323 = vst [vmem:[#allocation0 + $0x200] sm:$0x3] %v1145_v15 }
   0xc   :  { %448 = vst [vmem:[#allocation0 + $0x138] sm:$0x3] %v1170_v16  ;;  %v1171_v17 = vld [vmem:[%s1811_s0 + $0x4c] sm:$0x3]  ;;  %v1172_v18 = vld [vmem:[%s1811_s0 + $0x4a] sm:$0x3] }
   0xd   :  { %v1173_v19 = vld [vmem:[%s1811_s0 + $0x48] sm:$0x3]  ;;  %453 = vst [vmem:[#allocation0 + $0x130] sm:$0x3] %v1171_v17  ;;  %458 = vst [vmem:[#allocation0 + $0x128] sm:$0x3] %v1172_v18 }
   0xe   :  { %463 = vst [vmem:[#allocation0 + $0x120] sm:$0x3] %v1173_v19  ;;  %v1174_v20 = vld [vmem:[%s1811_s0 + $0x46] sm:$0x3]  ;;  %v1175_v21 = vld [vmem:[%s1811_s0 + $0x44] sm:$0x3] }
   0xf   :  { %v1176_v22 = vld [vmem:[%s1811_s0 + $0x42] sm:$0x3]  ;;  %468 = vst [vmem:[#allocation0 + $0x118] sm:$0x3] %v1174_v20  ;;  %473 = vst [vmem:[#allocation0 + $0x110] sm:$0x3] %v1175_v21 }
  0x10   :  { %478 = vst [vmem:[#allocation0 + $0x108] sm:$0x3] %v1176_v22  ;;  %v1177_v23 = vld [vmem:[%s1811_s0 + $0x40] sm:$0x3]  ;;  %v1106_v24 = vld [vmem:[%s1811_s0 + $0xce] sm:$0x3] }
  0x11   :  { %v1107_v25 = vld [vmem:[%s1811_s0 + $0xcc] sm:$0x3]  ;;  %v784_v26 = vld [vmem:[#allocation0 + $0x1] ss:$8 sm:$0xf0]  }
  0x12   :  { %483 = vst [vmem:[#allocation0 + $0x100] sm:$0x3] %v1177_v23  ;;  %128 = vst [vmem:[#allocation0 + $0x338] sm:$0x3] %v1106_v24  ;;  %v1108_v27 = vld [vmem:[%s1811_s0 + $0xca] sm:$0x3] }
  0x13   :  { %133 = vst [vmem:[#allocation0 + $0x330] sm:$0x3] %v1107_v25  ;;  %v782_v28 = vld [vmem:[#allocation0 + $0x1] ss:$8 sm:$0xf]  }
  0x14   :  { %138 = vst [vmem:[#allocation0 + $0x328] sm:$0x3] %v1108_v27  ;;  %v1109_v29 = vld [vmem:[%s1811_s0 + $0xc8] sm:$0x3]  ;;  %v786_v30 = vsel %vm642_vm0, %v784_v26, %v782_v28  ;;  %v1110_v31 = vld [vmem:[%s1811_s0 + $0xc6] sm:$0x3] }
  0x15   :  { %143 = vst [vmem:[#allocation0 + $0x320] sm:$0x3] %v1109_v29  ;;  %v1111_v32 = vld [vmem:[%s1811_s0 + $0xc4] sm:$0x3]  ;;  %v1112_v33 = vld [vmem:[%s1811_s0 + $0xc2] sm:$0x3]  ;;  %787 = vrot.lane.b32.xlu0 %v786_v30, %s1240_s10 }
  0x16   :  { %v805_v34 = vld [vmem:[#allocation0 + $0x201] ss:$8 sm:$0xf0]   ;;  %148 = vst [vmem:[#allocation0 + $0x318] sm:$0x3] %v1110_v31 }
  0x17   :  { %153 = vst [vmem:[#allocation0 + $0x310] sm:$0x3] %v1111_v32  ;;  %158 = vst [vmem:[#allocation0 + $0x308] sm:$0x3] %v1112_v33  ;;  %v1113_v35 = vld [vmem:[%s1811_s0 + $0xc0] sm:$0x3] }
  0x18   :  { %v803_v36 = vld [vmem:[#allocation0 + $0x201] ss:$8 sm:$0xf]   ;;  %163 = vst [vmem:[#allocation0 + $0x300] sm:$0x3] %v1113_v35 }
  0x19   :  { %v1194_v37 = vld [vmem:[%s1811_s0 + $0x1e] sm:$0x3]  ;;  %v807_v38 = vsel %vm642_vm0, %v805_v34, %v803_v36  ;;  %v794_v39 = vld [vmem:[#allocation0 + $0x101] ss:$8 sm:$0xf0]  }
  0x1a   :  { %568 = vst [vmem:[#allocation0 + $0x78] sm:$0x3] %v1194_v37  ;;  %v1195_v40 = vld [vmem:[%s1811_s0 + $0x1c] sm:$0x3]  ;;  %808 = vrot.lane.b32.xlu1 %v807_v38, %s1240_s10  ;;  %v1196_v41 = vld [vmem:[%s1811_s0 + $0x1a] sm:$0x3] }
  0x1b   :  { %573 = vst [vmem:[#allocation0 + $0x70] sm:$0x3] %v1195_v40  ;;  %v1197_v42 = vld [vmem:[%s1811_s0 + $0x18] sm:$0x3]  ;;  %v1198_v43 = vld [vmem:[%s1811_s0 + $0x16] sm:$0x3] }
  0x1c   :  { %v792_v44 = vld [vmem:[#allocation0 + $0x101] ss:$8 sm:$0xf]   ;;  %578 = vst [vmem:[#allocation0 + $0x68] sm:$0x3] %v1196_v41 }
  0x1d   :  { %583 = vst [vmem:[#allocation0 + $0x60] sm:$0x3] %v1197_v42  ;;  %588 = vst [vmem:[#allocation0 + $0x58] sm:$0x3] %v1198_v43  ;;  %v1199_v45 = vld [vmem:[%s1811_s0 + $0x14] sm:$0x3]  ;;  %v796_v46 = vsel %vm642_vm0, %v794_v39, %v792_v44 }
  0x1e   :  { %593 = vst [vmem:[#allocation0 + $0x50] sm:$0x3] %v1199_v45  ;;  %v1200_v47 = vld [vmem:[%s1811_s0 + $0x12] sm:$0x3]  ;;  %v1201_v48 = vld [vmem:[%s1811_s0 + $0x10] sm:$0x3]  ;;  %797 = vrot.lane.b32.xlu0 %v796_v46, %s1240_s10 }
  0x1f   :  { %v1162_v49 = vld [vmem:[%s1811_s0 + $0x5e] sm:$0x3]  ;;  %v816_v50 = vld [vmem:[#allocation0 + $0x301] ss:$8 sm:$0xf0]  }
  0x20   :  { %598 = vst [vmem:[#allocation0 + $0x48] sm:$0x3] %v1200_v47  ;;  %603 = vst [vmem:[#allocation0 + $0x40] sm:$0x3] %v1201_v48  ;;  %v1163_v51 = vld [vmem:[%s1811_s0 + $0x5c] sm:$0x3] }
  0x21   :  { %408 = vst [vmem:[#allocation0 + $0x178] sm:$0x3] %v1162_v49  ;;  %413 = vst [vmem:[#allocation0 + $0x170] sm:$0x3] %v1163_v51  ;;  %v1164_v52 = vld [vmem:[%s1811_s0 + $0x5a] sm:$0x3] }
  0x22   :  { %v1165_v53 = vld [vmem:[%s1811_s0 + $0x58] sm:$0x3]  ;;  %v1166_v54 = vld [vmem:[%s1811_s0 + $0x56] sm:$0x3]  ;;  %418 = vst [vmem:[#allocation0 + $0x168] sm:$0x3] %v1164_v52 }
  0x23   :  { %v814_v55 = vld [vmem:[#allocation0 + $0x301] ss:$8 sm:$0xf]   ;;  %423 = vst [vmem:[#allocation0 + $0x160] sm:$0x3] %v1165_v53 }
  0x24   :  { %428 = vst [vmem:[#allocation0 + $0x158] sm:$0x3] %v1166_v54  ;;  %v1167_v56 = vld [vmem:[%s1811_s0 + $0x54] sm:$0x3]  ;;  %v818_v57 = vsel %vm642_vm0, %v816_v50, %v814_v55  ;;  %v1168_v58 = vld [vmem:[%s1811_s0 + $0x52] sm:$0x3] }
  0x25   :  { %433 = vst [vmem:[#allocation0 + $0x150] sm:$0x3] %v1167_v56  ;;  %v1169_v59 = vld [vmem:[%s1811_s0 + $0x50] sm:$0x3]  ;;  %v1130_v60 = vld [vmem:[%s1811_s0 + $0x9e] sm:$0x3]  ;;  %819 = vrot.lane.b32.xlu1 %v818_v57, %s1240_s10 }
  0x26   :  { %438 = vst [vmem:[#allocation0 + $0x148] sm:$0x3] %v1168_v58  ;;  %443 = vst [vmem:[#allocation0 + $0x140] sm:$0x3] %v1169_v59  ;;  %v1131_v61 = vld [vmem:[%s1811_s0 + $0x9c] sm:$0x3] }
  0x27   :  { %248 = vst [vmem:[#allocation0 + $0x278] sm:$0x3] %v1130_v60  ;;  %v1132_v62 = vld [vmem:[%s1811_s0 + $0x9a] sm:$0x3]  ;;  %v1133_v63 = vld [vmem:[%s1811_s0 + $0x98] sm:$0x3] }
  0x28   :  { %v827_v0 = vld [vmem:[#allocation0 + $0x41] ss:$8 sm:$0xf0]   ;;  %253 = vst [vmem:[#allocation0 + $0x270] sm:$0x3] %v1131_v61 }
  0x29   :  { %258 = vst [vmem:[#allocation0 + $0x268] sm:$0x3] %v1132_v62  ;;  %263 = vst [vmem:[#allocation0 + $0x260] sm:$0x3] %v1133_v63  ;;  %v1134_v1 = vld [vmem:[%s1811_s0 + $0x96] sm:$0x3] }
  0x2a   :  { %268 = vst [vmem:[#allocation0 + $0x258] sm:$0x3] %v1134_v1  ;;  %v1135_v2 = vld [vmem:[%s1811_s0 + $0x94] sm:$0x3]  ;;  %v1136_v3 = vld [vmem:[%s1811_s0 + $0x92] sm:$0x3] }
  0x2b   :  { %v1137_v4 = vld [vmem:[%s1811_s0 + $0x90] sm:$0x3]  ;;  %273 = vst [vmem:[#allocation0 + $0x250] sm:$0x3] %v1135_v2  ;;  %278 = vst [vmem:[#allocation0 + $0x248] sm:$0x3] %v1136_v3 }
  0x2c   :  { %v825_v5 = vld [vmem:[#allocation0 + $0x41] ss:$8 sm:$0xf]   ;;  %283 = vst [vmem:[#allocation0 + $0x240] sm:$0x3] %v1137_v4 }
  0x2d   :  { %v1098_v6 = vld [vmem:[%s1811_s0 + $0xde] sm:$0x3]  ;;  %v829_v7 = vsel %vm642_vm0, %v827_v0, %v825_v5  ;;  %v1099_v8 = vld [vmem:[%s1811_s0 + $0xdc] sm:$0x3]  ;;  %v1100_v9 = vld [vmem:[%s1811_s0 + $0xda] sm:$0x3] }
  0x2e   :  { %88 = vst [vmem:[#allocation0 + $0x378] sm:$0x3] %v1098_v6  ;;  %v1101_v10 = vld [vmem:[%s1811_s0 + $0xd8] sm:$0x3]  ;;  %830 = vrot.lane.b32.xlu0 %v829_v7, %s1240_s10  ;;  %93 = vst [vmem:[#allocation0 + $0x370] sm:$0x3] %v1099_v8 }
  0x2f   :  { %v838_v11 = vld [vmem:[#allocation0 + $0x141] ss:$8 sm:$0xf0]   ;;  %98 = vst [vmem:[#allocation0 + $0x368] sm:$0x3] %v1100_v9 }
  0x30   :  { %103 = vst [vmem:[#allocation0 + $0x360] sm:$0x3] %v1101_v10  ;;  %v1102_v12 = vld [vmem:[%s1811_s0 + $0xd6] sm:$0x3]  ;;  %v1103_v13 = vld [vmem:[%s1811_s0 + $0xd4] sm:$0x3] }
  0x31   :  { %108 = vst [vmem:[#allocation0 + $0x358] sm:$0x3] %v1102_v12  ;;  %v1104_v14 = vld [vmem:[%s1811_s0 + $0xd2] sm:$0x3]  ;;  %v1105_v15 = vld [vmem:[%s1811_s0 + $0xd0] sm:$0x3] }
  0x32   :  { %v836_v16 = vld [vmem:[#allocation0 + $0x141] ss:$8 sm:$0xf]   ;;  %113 = vst [vmem:[#allocation0 + $0x350] sm:$0x3] %v1103_v13 }
  0x33   :  { %118 = vst [vmem:[#allocation0 + $0x348] sm:$0x3] %v1104_v14  ;;  %123 = vst [vmem:[#allocation0 + $0x340] sm:$0x3] %v1105_v15  ;;  %v1186_v17 = vld [vmem:[%s1811_s0 + $0x2e] sm:$0x3]  ;;  %v840_v18 = vsel %vm642_vm0, %v838_v11, %v836_v16 }
  0x34   :  { %v849_v19 = vld [vmem:[#allocation0 + $0x241] ss:$8 sm:$0xf0]   ;;  %528 = vst [vmem:[#allocation0 + $0xb8] sm:$0x3] %v1186_v17  ;;  %841 = vrot.lane.b32.xlu1 %v840_v18, %s1240_s10 }
  0x35   :  { %v1187_v20 = vld [vmem:[%s1811_s0 + $0x2c] sm:$0x3]  ;;  %v1188_v21 = vld [vmem:[%s1811_s0 + $0x2a] sm:$0x3]  ;;  %v1189_v22 = vld [vmem:[%s1811_s0 + $0x28] sm:$0x3] }
  0x36   :  { %533 = vst [vmem:[#allocation0 + $0xb0] sm:$0x3] %v1187_v20  ;;  %v1190_v23 = vld [vmem:[%s1811_s0 + $0x26] sm:$0x3]  ;;  %538 = vst [vmem:[#allocation0 + $0xa8] sm:$0x3] %v1188_v21 }
  0x37   :  { %v847_v24 = vld [vmem:[#allocation0 + $0x241] ss:$8 sm:$0xf]   ;;  %543 = vst [vmem:[#allocation0 + $0xa0] sm:$0x3] %v1189_v22 }
  0x38   :  { %548 = vst [vmem:[#allocation0 + $0x98] sm:$0x3] %v1190_v23  ;;  %v1191_v25 = vld [vmem:[%s1811_s0 + $0x24] sm:$0x3]  ;;  %v851_v26 = vsel %vm642_vm0, %v849_v19, %v847_v24  ;;  %v1192_v27 = vld [vmem:[%s1811_s0 + $0x22] sm:$0x3] }
  0x39   :  { %553 = vst [vmem:[#allocation0 + $0x90] sm:$0x3] %v1191_v25  ;;  %v1193_v28 = vld [vmem:[%s1811_s0 + $0x20] sm:$0x3]  ;;  %v1154_v29 = vld [vmem:[%s1811_s0 + $0x6e] sm:$0x3]  ;;  %852 = vrot.lane.b32.xlu0 %v851_v26, %s1240_s10 }
  0x3a   :  { %v860_v30 = vld [vmem:[#allocation0 + $0x341] ss:$8 sm:$0xf0]   ;;  %558 = vst [vmem:[#allocation0 + $0x88] sm:$0x3] %v1192_v27 }
  0x3b   :  { %563 = vst [vmem:[#allocation0 + $0x80] sm:$0x3] %v1193_v28  ;;  %368 = vst [vmem:[#allocation0 + $0x1b8] sm:$0x3] %v1154_v29  ;;  %v1155_v31 = vld [vmem:[%s1811_s0 + $0x6c] sm:$0x3] }
  0x3c   :  { %373 = vst [vmem:[#allocation0 + $0x1b0] sm:$0x3] %v1155_v31  ;;  %v1156_v32 = vld [vmem:[%s1811_s0 + $0x6a] sm:$0x3]  ;;  %v1157_v33 = vld [vmem:[%s1811_s0 + $0x68] sm:$0x3] }
  0x3d   :  { %v1158_v34 = vld [vmem:[%s1811_s0 + $0x66] sm:$0x3]  ;;  %v858_v35 = vld [vmem:[#allocation0 + $0x341] ss:$8 sm:$0xf]  }
  0x3e   :  { %378 = vst [vmem:[#allocation0 + $0x1a8] sm:$0x3] %v1156_v32  ;;  %383 = vst [vmem:[#allocation0 + $0x1a0] sm:$0x3] %v1157_v33  ;;  %v1159_v36 = vld [vmem:[%s1811_s0 + $0x64] sm:$0x3]  ;;  %v862_v37 = vsel %vm642_vm0, %v860_v30, %v858_v35 }
  0x3f   :  { %388 = vst [vmem:[#allocation0 + $0x198] sm:$0x3] %v1158_v34  ;;  %393 = vst [vmem:[#allocation0 + $0x190] sm:$0x3] %v1159_v36  ;;  %v1160_v38 = vld [vmem:[%s1811_s0 + $0x62] sm:$0x3]  ;;  %863 = vrot.lane.b32.xlu1 %v862_v37, %s1240_s10 }
  0x40   :  { %v1161_v39 = vld [vmem:[%s1811_s0 + $0x60] sm:$0x3]  ;;  %v1122_v40 = vld [vmem:[%s1811_s0 + $0xae] sm:$0x3]  ;;  %398 = vst [vmem:[#allocation0 + $0x188] sm:$0x3] %v1160_v38 }
  0x41   :  { %403 = vst [vmem:[#allocation0 + $0x180] sm:$0x3] %v1161_v39  ;;  %208 = vst [vmem:[#allocation0 + $0x2b8] sm:$0x3] %v1122_v40  ;;  %v1123_v41 = vld [vmem:[%s1811_s0 + $0xac] sm:$0x3] }
  0x42   :  { %v1124_v42 = vld [vmem:[%s1811_s0 + $0xaa] sm:$0x3]  ;;  %v1125_v43 = vld [vmem:[%s1811_s0 + $0xa8] sm:$0x3]  ;;  %213 = vst [vmem:[#allocation0 + $0x2b0] sm:$0x3] %v1123_v41 }
  0x43   :  { %v871_v44 = vld [vmem:[#allocation0 + $0x81] ss:$8 sm:$0xf0]   ;;  %218 = vst [vmem:[#allocation0 + $0x2a8] sm:$0x3] %v1124_v42 }
  0x44   :  { %223 = vst [vmem:[#allocation0 + $0x2a0] sm:$0x3] %v1125_v43  ;;  %v1126_v45 = vld [vmem:[%s1811_s0 + $0xa6] sm:$0x3]  ;;  %v1127_v46 = vld [vmem:[%s1811_s0 + $0xa4] sm:$0x3] }
  0x45   :  { %228 = vst [vmem:[#allocation0 + $0x298] sm:$0x3] %v1126_v45  ;;  %v1128_v47 = vld [vmem:[%s1811_s0 + $0xa2] sm:$0x3]  ;;  %v1129_v48 = vld [vmem:[%s1811_s0 + $0xa0] sm:$0x3] }
  0x46   :  { %v869_v49 = vld [vmem:[#allocation0 + $0x81] ss:$8 sm:$0xf]   ;;  %233 = vst [vmem:[#allocation0 + $0x290] sm:$0x3] %v1127_v46 }
  0x47   :  { %238 = vst [vmem:[#allocation0 + $0x288] sm:$0x3] %v1128_v47  ;;  %243 = vst [vmem:[#allocation0 + $0x280] sm:$0x3] %v1129_v48  ;;  %v1090_v50 = vld [vmem:[%s1811_s0 + $0xee] sm:$0x3]  ;;  %v873_v51 = vsel %vm642_vm0, %v871_v44, %v869_v49 }
  0x48   :  { %48 = vst [vmem:[#allocation0 + $0x3b8] sm:$0x3] %v1090_v50  ;;  %v1091_v52 = vld [vmem:[%s1811_s0 + $0xec] sm:$0x3]  ;;  %v1092_v53 = vld [vmem:[%s1811_s0 + $0xea] sm:$0x3]  ;;  %874 = vrot.lane.b32.xlu0 %v873_v51, %s1240_s10 }
  0x49   :  { %v1093_v54 = vld [vmem:[%s1811_s0 + $0xe8] sm:$0x3]  ;;  %53 = vst [vmem:[#allocation0 + $0x3b0] sm:$0x3] %v1091_v52  ;;  %58 = vst [vmem:[#allocation0 + $0x3a8] sm:$0x3] %v1092_v53 }
  0x4a   :  { %v882_v55 = vld [vmem:[#allocation0 + $0x181] ss:$8 sm:$0xf0]   ;;  %63 = vst [vmem:[#allocation0 + $0x3a0] sm:$0x3] %v1093_v54 }
  0x4b   :  { %v1094_v56 = vld [vmem:[%s1811_s0 + $0xe6] sm:$0x3]  ;;  %v1095_v57 = vld [vmem:[%s1811_s0 + $0xe4] sm:$0x3]  ;;  %v1096_v58 = vld [vmem:[%s1811_s0 + $0xe2] sm:$0x3] }
  0x4c   :  { %68 = vst [vmem:[#allocation0 + $0x398] sm:$0x3] %v1094_v56  ;;  %v1097_v59 = vld [vmem:[%s1811_s0 + $0xe0] sm:$0x3]  ;;  %73 = vst [vmem:[#allocation0 + $0x390] sm:$0x3] %v1095_v57 }
  0x4d   :  { %v880_v60 = vld [vmem:[#allocation0 + $0x181] ss:$8 sm:$0xf]   ;;  %78 = vst [vmem:[#allocation0 + $0x388] sm:$0x3] %v1096_v58 }
  0x4e   :  { %83 = vst [vmem:[#allocation0 + $0x380] sm:$0x3] %v1097_v59  ;;  %v1178_v61 = vld [vmem:[%s1811_s0 + $0x3e] sm:$0x3]  ;;  %v884_v62 = vsel %vm642_vm0, %v882_v55, %v880_v60  ;;  %v1179_v0 = vld [vmem:[%s1811_s0 + $0x3c] sm:$0x3] }
  0x4f   :  { %v893_v63 = vld [vmem:[#allocation0 + $0x281] ss:$8 sm:$0xf0]   ;;  %488 = vst [vmem:[#allocation0 + $0xf8] sm:$0x3] %v1178_v61  ;;  %885 = vrot.lane.b32.xlu1 %v884_v62, %s1240_s10 }
  0x50   :  { %493 = vst [vmem:[#allocation0 + $0xf0] sm:$0x3] %v1179_v0  ;;  %v1180_v1 = vld [vmem:[%s1811_s0 + $0x3a] sm:$0x3]  ;;  %v1181_v2 = vld [vmem:[%s1811_s0 + $0x38] sm:$0x3] }
  0x51   :  { %v1182_v3 = vld [vmem:[%s1811_s0 + $0x36] sm:$0x3]  ;;  %v891_v4 = vld [vmem:[#allocation0 + $0x281] ss:$8 sm:$0xf]  }
  0x52   :  { %498 = vst [vmem:[#allocation0 + $0xe8] sm:$0x3] %v1180_v1  ;;  %503 = vst [vmem:[#allocation0 + $0xe0] sm:$0x3] %v1181_v2  ;;  %v1183_v5 = vld [vmem:[%s1811_s0 + $0x34] sm:$0x3]  ;;  %v895_v6 = vsel %vm642_vm0, %v893_v63, %v891_v4 }
  0x53   :  { %508 = vst [vmem:[#allocation0 + $0xd8] sm:$0x3] %v1182_v3  ;;  %513 = vst [vmem:[#allocation0 + $0xd0] sm:$0x3] %v1183_v5  ;;  %v1184_v7 = vld [vmem:[%s1811_s0 + $0x32] sm:$0x3]  ;;  %896 = vrot.lane.b32.xlu0 %v895_v6, %s1240_s10 }
  0x54   :  { %v1185_v8 = vld [vmem:[%s1811_s0 + $0x30] sm:$0x3]  ;;  %v1146_v9 = vld [vmem:[%s1811_s0 + $0x7e] sm:$0x3]  ;;  %518 = vst [vmem:[#allocation0 + $0xc8] sm:$0x3] %v1184_v7 }
  0x55   :  { %v904_v10 = vld [vmem:[#allocation0 + $0x381] ss:$8 sm:$0xf0]   ;;  %523 = vst [vmem:[#allocation0 + $0xc0] sm:$0x3] %v1185_v8 }
  0x56   :  { %328 = vst [vmem:[#allocation0 + $0x1f8] sm:$0x3] %v1146_v9  ;;  %v1147_v11 = vld [vmem:[%s1811_s0 + $0x7c] sm:$0x3]  ;;  %v1148_v12 = vld [vmem:[%s1811_s0 + $0x7a] sm:$0x3] }
  0x57   :  { %333 = vst [vmem:[#allocation0 + $0x1f0] sm:$0x3] %v1147_v11  ;;  %v1149_v13 = vld [vmem:[%s1811_s0 + $0x78] sm:$0x3]  ;;  %v1150_v14 = vld [vmem:[%s1811_s0 + $0x76] sm:$0x3] }
  0x58   :  { %v902_v15 = vld [vmem:[#allocation0 + $0x381] ss:$8 sm:$0xf]   ;;  %338 = vst [vmem:[#allocation0 + $0x1e8] sm:$0x3] %v1148_v12 }
  0x59   :  { %343 = vst [vmem:[#allocation0 + $0x1e0] sm:$0x3] %v1149_v13  ;;  %348 = vst [vmem:[#allocation0 + $0x1d8] sm:$0x3] %v1150_v14  ;;  %v1151_v16 = vld [vmem:[%s1811_s0 + $0x74] sm:$0x3]  ;;  %v906_v17 = vsel %vm642_vm0, %v904_v10, %v902_v15 }
  0x5a   :  { %353 = vst [vmem:[#allocation0 + $0x1d0] sm:$0x3] %v1151_v16  ;;  %v1152_v18 = vld [vmem:[%s1811_s0 + $0x72] sm:$0x3]  ;;  %v1153_v19 = vld [vmem:[%s1811_s0 + $0x70] sm:$0x3]  ;;  %907 = vrot.lane.b32.xlu1 %v906_v17, %s1240_s10 }
  0x5b   :  { %v1114_v20 = vld [vmem:[%s1811_s0 + $0xbe] sm:$0x3]  ;;  %358 = vst [vmem:[#allocation0 + $0x1c8] sm:$0x3] %v1152_v18  ;;  %363 = vst [vmem:[#allocation0 + $0x1c0] sm:$0x3] %v1153_v19 }
  0x5c   :  { %168 = vst [vmem:[#allocation0 + $0x2f8] sm:$0x3] %v1114_v20  ;;  %v1115_v21 = vld [vmem:[%s1811_s0 + $0xbc] sm:$0x3]  ;;  %v1116_v22 = vld [vmem:[%s1811_s0 + $0xba] sm:$0x3] }
  0x5d   :  { %v1117_v23 = vld [vmem:[%s1811_s0 + $0xb8] sm:$0x3]  ;;  %173 = vst [vmem:[#allocation0 + $0x2f0] sm:$0x3] %v1115_v21  ;;  %178 = vst [vmem:[#allocation0 + $0x2e8] sm:$0x3] %v1116_v22 }
  0x5e   :  { %v915_v24 = vld [vmem:[#allocation0 + $0xc1] ss:$8 sm:$0xf0]   ;;  %183 = vst [vmem:[#allocation0 + $0x2e0] sm:$0x3] %v1117_v23 }
  0x5f   :  { %v1118_v25 = vld [vmem:[%s1811_s0 + $0xb6] sm:$0x3]  ;;  %v1119_v26 = vld [vmem:[%s1811_s0 + $0xb4] sm:$0x3]  ;;  %v1120_v27 = vld [vmem:[%s1811_s0 + $0xb2] sm:$0x3] }
  0x60   :  { %188 = vst [vmem:[#allocation0 + $0x2d8] sm:$0x3] %v1118_v25  ;;  %v1121_v28 = vld [vmem:[%s1811_s0 + $0xb0] sm:$0x3]  ;;  %193 = vst [vmem:[#allocation0 + $0x2d0] sm:$0x3] %v1119_v26 }
  0x61   :  { %v913_v29 = vld [vmem:[#allocation0 + $0xc1] ss:$8 sm:$0xf]   ;;  %198 = vst [vmem:[#allocation0 + $0x2c8] sm:$0x3] %v1120_v27 }
  0x62   :  { %203 = vst [vmem:[#allocation0 + $0x2c0] sm:$0x3] %v1121_v28  ;;  %v1082_v30 = vld [vmem:[%s1811_s0 + $0xfe] sm:$0x3]  ;;  %v917_v31 = vsel %vm642_vm0, %v915_v24, %v913_v29  ;;  %v1083_v32 = vld [vmem:[%s1811_s0 + $0xfc] sm:$0x3] }
  0x63   :  { %8 = vst [vmem:[#allocation0 + $0x3f8] sm:$0x3] %v1082_v30  ;;  %v1084_v33 = vld [vmem:[%s1811_s0 + $0xfa] sm:$0x3]  ;;  %v1085_v34 = vld [vmem:[%s1811_s0 + $0xf8] sm:$0x3]  ;;  %918 = vrot.lane.b32.xlu0 %v917_v31, %s1240_s10 }
  0x64   :  { %v926_v35 = vld [vmem:[#allocation0 + $0x1c1] ss:$8 sm:$0xf0]   ;;  %13 = vst [vmem:[#allocation0 + $0x3f0] sm:$0x3] %v1083_v32 }
  0x65   :  { %18 = vst [vmem:[#allocation0 + $0x3e8] sm:$0x3] %v1084_v33  ;;  %23 = vst [vmem:[#allocation0 + $0x3e0] sm:$0x3] %v1085_v34  ;;  %v1086_v36 = vld [vmem:[%s1811_s0 + $0xf6] sm:$0x3] }
  0x66   :  { %28 = vst [vmem:[#allocation0 + $0x3d8] sm:$0x3] %v1086_v36  ;;  %v1087_v37 = vld [vmem:[%s1811_s0 + $0xf4] sm:$0x3]  ;;  %v1088_v38 = vld [vmem:[%s1811_s0 + $0xf2] sm:$0x3] }
  0x67   :  { %v1089_v39 = vld [vmem:[%s1811_s0 + $0xf0] sm:$0x3]  ;;  %33 = vst [vmem:[#allocation0 + $0x3d0] sm:$0x3] %v1087_v37  ;;  %38 = vst [vmem:[#allocation0 + $0x3c8] sm:$0x3] %v1088_v38 }
  0x68   :  { %v924_v40 = vld [vmem:[#allocation0 + $0x1c1] ss:$8 sm:$0xf]   ;;  %43 = vst [vmem:[#allocation0 + $0x3c0] sm:$0x3] %v1089_v39 }
  0x69   :  { %v640_v41 = vld [vmem:[#allocation0] ss:$8 sm:$0xf]   ;;  %v928_v42 = vsel %vm642_vm0, %v926_v35, %v924_v40  ;;  %v937_v43 = vld [vmem:[#allocation0 + $0x2c1] ss:$8 sm:$0xf0]  }
  0x6a   :  { %v641_v44 = vld [vmem:[#allocation0] ss:$8 sm:$0xf0]   ;;  %929 = vrot.lane.b32.xlu1 %v928_v42, %s1240_s10  ;;  %v935_v48 = vld [vmem:[#allocation0 + $0x2c1] ss:$8 sm:$0xf]  }
  0x6b   :  { %v643_v45 = vsel %vm642_vm0, %v641_v44, %v640_v41  ;;  %v710_v46 = vld [vmem:[#allocation0 + $0x200] ss:$8 sm:$0xf]   ;;  %v939_v51 = vsel %vm642_vm0, %v937_v43, %v935_v48 }
  0x6c   :  { %v712_v47 = vld [vmem:[#allocation0 + $0x200] ss:$8 sm:$0xf0]   ;;  %645 = vst.msk [vmem:[%s1812_s1] sm:$0xff] %vm644_vm1, %v643_v45   ;;  %940 = vrot.lane.b32.xlu0 %v939_v51, %s1240_s10 }
  0x6d   :  { %v714_v49 = vsel %vm642_vm0, %v712_v47, %v710_v46  ;;  %v674_v50 = vld [vmem:[#allocation0 + $0x100] ss:$8 sm:$0xf]   ;;  %v948_v54 = vld [vmem:[#allocation0 + $0x3c1] ss:$8 sm:$0xf0]  }
  0x6e   :  { %1216 = vst.msk [vmem:[%s1812_s1 + $0x40] sm:$0xff] %vm644_vm1, %v714_v49   ;;  %v676_v52 = vld [vmem:[#allocation0 + $0x100] ss:$8 sm:$0xf0]  }
  0x6f   :  { %v746_v53 = vld [vmem:[#allocation0 + $0x300] ss:$8 sm:$0xf]   ;;  %v678_v55 = vsel %vm642_vm0, %v676_v52, %v674_v50  ;;  %v946_v60 = vld [vmem:[#allocation0 + $0x3c1] ss:$8 sm:$0xf]  }
  0x70   :  { %v748_v56 = vld [vmem:[#allocation0 + $0x300] ss:$8 sm:$0xf0]   ;;  %1212 = vst.msk [vmem:[%s1812_s1 + $0x20] sm:$0xff] %vm644_vm1, %v678_v55   ;;  %v950_v63 = vsel %vm642_vm0, %v948_v54, %v946_v60 }
  0x71   :  { %v750_v57 = vsel %vm642_vm0, %v748_v56, %v746_v53  ;;  %v647_v58 = vld [vmem:[#allocation0 + $0x40] ss:$8 sm:$0xf]   ;;  %951 = vrot.lane.b32.xlu1 %v950_v63, %s1240_s10 }
  0x72   :  { %v649_v59 = vld [vmem:[#allocation0 + $0x40] ss:$8 sm:$0xf0]   ;;  %1220 = vst.msk [vmem:[%s1812_s1 + $0x60] sm:$0xff] %vm644_vm1, %v750_v57  }
  0x73   :  { %v651_v61 = vsel %vm642_vm0, %v649_v59, %v647_v58  ;;  %v683_v62 = vld [vmem:[#allocation0 + $0x140] ss:$8 sm:$0xf]  }
  0x74   :  { %1209 = vst.msk [vmem:[%s1812_s1 + $0x8] sm:$0xff] %vm644_vm1, %v651_v61   ;;  %v685_v0 = vld [vmem:[#allocation0 + $0x140] ss:$8 sm:$0xf0]  }
  0x75   :  { %v719_v1 = vld [vmem:[#allocation0 + $0x240] ss:$8 sm:$0xf]   ;;  %v687_v2 = vsel %vm642_vm0, %v685_v0, %v683_v62 }
  0x76   :  { %v721_v3 = vld [vmem:[#allocation0 + $0x240] ss:$8 sm:$0xf0]   ;;  %1213 = vst.msk [vmem:[%s1812_s1 + $0x28] sm:$0xff] %vm644_vm1, %v687_v2  }
  0x77   :  { %v755_v4 = vld [vmem:[#allocation0 + $0x340] ss:$8 sm:$0xf]   ;;  %v723_v5 = vsel %vm642_vm0, %v721_v3, %v719_v1 }
  0x78   :  { %v757_v6 = vld [vmem:[#allocation0 + $0x340] ss:$8 sm:$0xf0]   ;;  %1217 = vst.msk [vmem:[%s1812_s1 + $0x48] sm:$0xff] %vm644_vm1, %v723_v5  }
  0x79   :  { %v656_v7 = vld [vmem:[#allocation0 + $0x80] ss:$8 sm:$0xf]   ;;  %v759_v8 = vsel %vm642_vm0, %v757_v6, %v755_v4 }
  0x7a   :  { %v658_v9 = vld [vmem:[#allocation0 + $0x80] ss:$8 sm:$0xf0]   ;;  %1221 = vst.msk [vmem:[%s1812_s1 + $0x68] sm:$0xff] %vm644_vm1, %v759_v8  }
  0x7b   :  { %v692_v10 = vld [vmem:[#allocation0 + $0x180] ss:$8 sm:$0xf]   ;;  %v660_v11 = vsel %vm642_vm0, %v658_v9, %v656_v7 }
  0x7c   :  { %v694_v12 = vld [vmem:[#allocation0 + $0x180] ss:$8 sm:$0xf0]   ;;  %1210 = vst.msk [vmem:[%s1812_s1 + $0x10] sm:$0xff] %vm644_vm1, %v660_v11  }
  0x7d   :  { %v728_v13 = vld [vmem:[#allocation0 + $0x280] ss:$8 sm:$0xf]   ;;  %v696_v14 = vsel %vm642_vm0, %v694_v12, %v692_v10 }
  0x7e   :  { %v730_v15 = vld [vmem:[#allocation0 + $0x280] ss:$8 sm:$0xf0]   ;;  %1214 = vst.msk [vmem:[%s1812_s1 + $0x30] sm:$0xff] %vm644_vm1, %v696_v14  }
  0x7f   :  { %v764_v16 = vld [vmem:[#allocation0 + $0x380] ss:$8 sm:$0xf]   ;;  %v732_v17 = vsel %vm642_vm0, %v730_v15, %v728_v13 }
  0x80   :  { %v766_v18 = vld [vmem:[#allocation0 + $0x380] ss:$8 sm:$0xf0]   ;;  %1218 = vst.msk [vmem:[%s1812_s1 + $0x50] sm:$0xff] %vm644_vm1, %v732_v17  }
  0x81   :  { %v665_v19 = vld [vmem:[#allocation0 + $0xc0] ss:$8 sm:$0xf]   ;;  %v768_v20 = vsel %vm642_vm0, %v766_v18, %v764_v16 }
  0x82   :  { %v667_v21 = vld [vmem:[#allocation0 + $0xc0] ss:$8 sm:$0xf0]   ;;  %1222 = vst.msk [vmem:[%s1812_s1 + $0x70] sm:$0xff] %vm644_vm1, %v768_v20  }
  0x83   :  { %v701_v22 = vld [vmem:[#allocation0 + $0x1c0] ss:$8 sm:$0xf]   ;;  %v669_v23 = vsel %vm642_vm0, %v667_v21, %v665_v19 }
  0x84   :  { %v703_v24 = vld [vmem:[#allocation0 + $0x1c0] ss:$8 sm:$0xf0]   ;;  %1211 = vst.msk [vmem:[%s1812_s1 + $0x18] sm:$0xff] %vm644_vm1, %v669_v23  }
  0x85   :  { %v737_v25 = vld [vmem:[#allocation0 + $0x2c0] ss:$8 sm:$0xf]   ;;  %v705_v26 = vsel %vm642_vm0, %v703_v24, %v701_v22 }
  0x86   :  { %v739_v27 = vld [vmem:[#allocation0 + $0x2c0] ss:$8 sm:$0xf0]   ;;  %1215 = vst.msk [vmem:[%s1812_s1 + $0x38] sm:$0xff] %vm644_vm1, %v705_v26  }
  0x87   :  { %v773_v28 = vld [vmem:[#allocation0 + $0x3c0] ss:$8 sm:$0xf]   ;;  %v741_v29 = vsel %vm642_vm0, %v739_v27, %v737_v25  ;;  %v788_v32 = vpop.permute.xlu0 %787  }
  0x88   :  { %v775_v30 = vld [vmem:[#allocation0 + $0x3c0] ss:$8 sm:$0xf0]   ;;  %1219 = vst.msk [vmem:[%s1812_s1 + $0x58] sm:$0xff] %vm644_vm1, %v741_v29  }
  0x89   :  { %v777_v31 = vsel %vm642_vm0, %v775_v30, %v773_v28  ;;  %790 = vst.msk [vmem:[%s1812_s1] sm:$0xff] %vm789_vm2, %v788_v32  }
  0x8a   :  { %1223 = vst.msk [vmem:[%s1812_s1 + $0x78] sm:$0xff] %vm644_vm1, %v777_v31  }
  0x8c   :  { %v809_v33 = vpop.permute.xlu1 %808  }
  0x8d   :  { %1225 = vst.msk [vmem:[%s1812_s1 + $0x40] sm:$0xff] %vm789_vm2, %v809_v33  }
  0x90   :  { %v798_v34 = vpop.permute.xlu0 %797  }
  0x91   :  { %1224 = vst.msk [vmem:[%s1812_s1 + $0x20] sm:$0xff] %vm789_vm2, %v798_v34  }
  0x97   :  { %v820_v35 = vpop.permute.xlu1 %819  }
  0x98   :  { %1226 = vst.msk [vmem:[%s1812_s1 + $0x60] sm:$0xff] %vm789_vm2, %v820_v35  }
  0xa0   :  { %v831_v36 = vpop.permute.xlu0 %830  }
  0xa1   :  { %1227 = vst.msk [vmem:[%s1812_s1 + $0x8] sm:$0xff] %vm789_vm2, %v831_v36  }
  0xa6   :  { %v842_v37 = vpop.permute.xlu1 %841  }
  0xa7   :  { %1228 = vst.msk [vmem:[%s1812_s1 + $0x28] sm:$0xff] %vm789_vm2, %v842_v37  }
  0xab   :  { %v853_v38 = vpop.permute.xlu0 %852  }
  0xac   :  { %1229 = vst.msk [vmem:[%s1812_s1 + $0x48] sm:$0xff] %vm789_vm2, %v853_v38  }
  0xb1   :  { %v864_v39 = vpop.permute.xlu1 %863  }
  0xb2   :  { %1230 = vst.msk [vmem:[%s1812_s1 + $0x68] sm:$0xff] %vm789_vm2, %v864_v39  }
  0xba   :  { %v875_v40 = vpop.permute.xlu0 %874  }
  0xbb   :  { %1231 = vst.msk [vmem:[%s1812_s1 + $0x10] sm:$0xff] %vm789_vm2, %v875_v40  }
  0xc1   :  { %v886_v41 = vpop.permute.xlu1 %885  }
  0xc2   :  { %1232 = vst.msk [vmem:[%s1812_s1 + $0x30] sm:$0xff] %vm789_vm2, %v886_v41  }
  0xc5   :  { %v897_v42 = vpop.permute.xlu0 %896  }
  0xc6   :  { %1233 = vst.msk [vmem:[%s1812_s1 + $0x50] sm:$0xff] %vm789_vm2, %v897_v42  }
  0xcc   :  { %v908_v43 = vpop.permute.xlu1 %907  }
  0xcd   :  { %1234 = vst.msk [vmem:[%s1812_s1 + $0x70] sm:$0xff] %vm789_vm2, %v908_v43  }
  0xd5   :  { %v919_v44 = vpop.permute.xlu0 %918  }
  0xd6   :  { %1235 = vst.msk [vmem:[%s1812_s1 + $0x18] sm:$0xff] %vm789_vm2, %v919_v44  }
  0xdc   :  { %v930_v45 = vpop.permute.xlu1 %929  }
  0xdd   :  { %1236 = vst.msk [vmem:[%s1812_s1 + $0x38] sm:$0xff] %vm789_vm2, %v930_v45  }
  0xde   :  { %v941_v46 = vpop.permute.xlu0 %940  }
  0xdf   :  { %1237 = vst.msk [vmem:[%s1812_s1 + $0x58] sm:$0xff] %vm789_vm2, %v941_v46  }
  0xe3   :  { %v952_v47 = vpop.permute.xlu1 %951  }
  0xe4   :  { %1238 = vst.msk [vmem:[%s1812_s1 + $0x78] sm:$0xff] %vm789_vm2, %v952_v47  }

// kernel: tile.13
= control target key start
LH: loop header
LB: loop body
LE: loop exit
PB: predicated region body
PF: predicated region fallthrough
CT: control target
= control target key end

     0   :  { %s40_s0 = inlined_call_operand.vmem [shape: f32[4], index: 0, kind: input, shape index: {}]   ;;  %s41_s1 = inlined_call_operand.vmem [shape: f32[32,4], index: 1, kind: output, shape index: {}]  }
   0x1   :  { %v4_v0 = vld [vmem:[%s40_s0] ss:$0 sm:$0xff] }
   0x2   :  { %5 = vst [vmem:[%s41_s1] sm:$0xff] %v4_v0  ;;  %12 = vst [vmem:[%s41_s1 + $0x8] sm:$0xff] %v4_v0 }
   0x3   :  { %13 = vst [vmem:[%s41_s1 + $0x10] sm:$0xff] %v4_v0  ;;  %14 = vst [vmem:[%s41_s1 + $0x18] sm:$0xff] %v4_v0 }

// kernel: tile.14
= control target key start
LH: loop header
LB: loop body
LE: loop exit
PB: predicated region body
PF: predicated region fallthrough
CT: control target
= control target key end

     0   :  { %s259_s10 = smov 124   ;;  %s260_s11 = smov 116   ;;  %vm3_vm0 = vcmask 31744   ;;  %vm9_vm1 = vcmask 1048544   ;;  %vm15_vm2 = vcmask 1015744   ;;  %vm21_vm3 = vcmask 982944   ;;  %s399_s0 = inlined_call_operand.vmem [shape: f32[32,4], index: 0, kind: input, shape index: {}]   ;;  %s400_s1 = inlined_call_operand.vmem [shape: f32[1,128], index: 1, kind: output, shape index: {}]  }
   0x1   :  { %v197_v0 = vld [vmem:[%s399_s0 + $0x1f] sm:$0x1]   ;;  %v199_v1 = vld [vmem:[%s399_s0 + $0x1d] sm:$0x1]   ;;  %v198_v2 = vld [vmem:[%s399_s0 + $0x1e] sm:$0x1]  }
   0x2   :  { %7 = vrot.lane.b32.xlu0 %v197_v0, %s259_s10  ;;  %19 = vrot.lane.b32.xlu1 %v199_v1, %s260_s11  ;;  %v200_v3 = vld [vmem:[%s399_s0 + $0x1c] sm:$0x1]   ;;  %s261_s16 = smov 120   ;;  %s262_s17 = smov 112   ;;  %v201_v4 = vld [vmem:[%s399_s0 + $0x1b] sm:$0x1]  }
   0x3   :  { %v202_v5 = vld [vmem:[%s399_s0 + $0x1a] sm:$0x1]   ;;  %s263_s22 = smov 108   ;;  %s264_s23 = smov 104   ;;  %v203_v6 = vld [vmem:[%s399_s0 + $0x19] sm:$0x1]  }
   0x4   :  { %v204_v7 = vld [vmem:[%s399_s0 + $0x18] sm:$0x1]   ;;  %s265_s28 = smov 100   ;;  %s266_s29 = smov 96   ;;  %v205_v8 = vld [vmem:[%s399_s0 + $0x17] sm:$0x1]  }
   0x5   :  { %v206_v9 = vld [vmem:[%s399_s0 + $0x16] sm:$0x1]   ;;  %v2_v10 = vld [vmem:[%s399_s0] sm:$0x1]   ;;  %s267_s7 = smov 92   ;;  %s268_s8 = smov 88  }
   0x6   :  { %13 = vrot.lane.b32.xlu0 %v198_v2, %s261_s16  ;;  %25 = vrot.lane.b32.xlu1 %v200_v3, %s262_s17  ;;  %4 = vst.msk [vmem:[#allocation0] sm:$0x1] %vm3_vm0, %v2_v10   ;;  %v207_v11 = vld [vmem:[%s399_s0 + $0x15] sm:$0x1]   ;;  %v208_v12 = vld [vmem:[%s399_s0 + $0x14] sm:$0x1]  }
   0x7   :  { %s269_s13 = smov 84   ;;  %s270_s14 = smov 80   ;;  %v209_v13 = vld [vmem:[%s399_s0 + $0x13] sm:$0x1]   ;;  %v210_v14 = vld [vmem:[%s399_s0 + $0x12] sm:$0x1]  }
   0x8   :  { %s271_s19 = smov 76   ;;  %s272_s20 = smov 72   ;;  %v211_v15 = vld [vmem:[%s399_s0 + $0x11] sm:$0x1]   ;;  %v212_v16 = vld [vmem:[%s399_s0 + $0x10] sm:$0x1]  }
   0x9   :  { %s273_s25 = smov 68   ;;  %s274_s26 = smov 64   ;;  %v213_v17 = vld [vmem:[%s399_s0 + $0xf] sm:$0x1]   ;;  %v214_v18 = vld [vmem:[%s399_s0 + $0xe] sm:$0x1]  }
   0xa   :  { %31 = vrot.lane.b32.xlu0 %v201_v4, %s263_s22  ;;  %37 = vrot.lane.b32.xlu1 %v202_v5, %s264_s23  ;;  %s275_s2 = smov 60   ;;  %s276_s3 = smov 56   ;;  %v215_v19 = vld [vmem:[%s399_s0 + $0xd] sm:$0x1]   ;;  %v216_v20 = vld [vmem:[%s399_s0 + $0xc] sm:$0x1]  }
   0xb   :  { %s278_s9 = smov 48   ;;  %v217_v21 = vld [vmem:[%s399_s0 + $0xb] sm:$0x1]   ;;  %v218_v22 = vld [vmem:[%s399_s0 + $0xa] sm:$0x1]   ;;  %s280_s15 = smov 40  }
   0xc   :  { %v219_v23 = vld [vmem:[%s399_s0 + $0x9] sm:$0x1]   ;;  %v220_v24 = vld [vmem:[%s399_s0 + $0x8] sm:$0x1]   ;;  %s282_s21 = smov 32   ;;  %s284_s27 = smov 24  }
   0xd   :  { %v221_v25 = vld [vmem:[%s399_s0 + $0x7] sm:$0x1]   ;;  %v222_v26 = vld [vmem:[%s399_s0 + $0x6] sm:$0x1]   ;;  %v223_v27 = vld [vmem:[%s399_s0 + $0x5] sm:$0x1]  }
   0xe   :  { %43 = vrot.lane.b32.xlu0 %v203_v6, %s265_s28  ;;  %49 = vrot.lane.b32.xlu1 %v204_v7, %s266_s29  ;;  %v224_v28 = vld [vmem:[%s399_s0 + $0x4] sm:$0x1]   ;;  %s286_s4 = smov 16   ;;  %v225_v29 = vld [vmem:[%s399_s0 + $0x3] sm:$0x1]   ;;  %s288_s10 = smov 8  }
   0xf   :  { %v226_v30 = vld [vmem:[%s399_s0 + $0x2] sm:$0x1]   ;;  %v227_v31 = vld [vmem:[%s399_s0 + $0x1] sm:$0x1]   ;;  %s289_s0 = smov 4   ;;  %vm27_vm4 = vcmask 950144  }
  0x10   :  { %vm33_vm5 = vcmask 917344   ;;  %vm39_vm6 = vcmask 884544   ;;  %vm45_vm7 = vcmask 851744   ;;  %vm51_vm8 = vcmask 818944  }
  0x11   :  { %vm57_vm9 = vcmask 786144   ;;  %vm63_vm10 = vcmask 753344   ;;  %vm69_vm11 = vcmask 720544   ;;  %vm75_vm12 = vcmask 687744  }
  0x12   :  { %55 = vrot.lane.b32.xlu0 %v205_v8, %s267_s7  ;;  %61 = vrot.lane.b32.xlu1 %v206_v9, %s268_s8  ;;  %s277_s8 = smov 52   ;;  %vm81_vm13 = vcmask 654944   ;;  %vm87_vm14 = vcmask 622144   ;;  %vm93_vm15 = vcmask 589344   ;;  %vm99_vm0 = vcmask 556544  }
  0x16   :  { %67 = vrot.lane.b32.xlu0 %v207_v11, %s269_s13  ;;  %73 = vrot.lane.b32.xlu1 %v208_v12, %s270_s14  ;;  %s279_s14 = smov 44  }
  0x1a   :  { %79 = vrot.lane.b32.xlu0 %v209_v13, %s271_s19  ;;  %85 = vrot.lane.b32.xlu1 %v210_v14, %s272_s20  ;;  %s281_s20 = smov 36  }
  0x1e   :  { %91 = vrot.lane.b32.xlu0 %v211_v15, %s273_s25  ;;  %97 = vrot.lane.b32.xlu1 %v212_v16, %s274_s26  ;;  %s283_s26 = smov 28  }
  0x22   :  { %103 = vrot.lane.b32.xlu0 %v213_v17, %s275_s2  ;;  %109 = vrot.lane.b32.xlu1 %v214_v18, %s276_s3  ;;  %s285_s3 = smov 20  }
  0x26   :  { %115 = vrot.lane.b32.xlu0 %v215_v19, %s277_s8  ;;  %121 = vrot.lane.b32.xlu1 %v216_v20, %s278_s9  ;;  %s287_s9 = smov 12  }
  0x2a   :  { %127 = vrot.lane.b32.xlu0 %v217_v21, %s279_s14  ;;  %133 = vrot.lane.b32.xlu1 %v218_v22, %s280_s15 }
  0x2e   :  { %139 = vrot.lane.b32.xlu0 %v219_v23, %s281_s20  ;;  %145 = vrot.lane.b32.xlu1 %v220_v24, %s282_s21 }
  0x32   :  { %151 = vrot.lane.b32.xlu0 %v221_v25, %s283_s26  ;;  %157 = vrot.lane.b32.xlu1 %v222_v26, %s284_s27 }
  0x36   :  { %163 = vrot.lane.b32.xlu0 %v223_v27, %s285_s3  ;;  %169 = vrot.lane.b32.xlu1 %v224_v28, %s286_s4 }
  0x3a   :  { %175 = vrot.lane.b32.xlu0 %v225_v29, %s287_s9  ;;  %181 = vrot.lane.b32.xlu1 %v226_v30, %s288_s10 }
  0x3e   :  { %187 = vrot.lane.b32.xlu0 %v227_v31, %s289_s0 }
  0x74   :  { %v8_v32 = vpop.permute.xlu0 %7   ;;  %v20_v33 = vpop.permute.xlu1 %19  }
  0x75   :  { %10 = vst.msk [vmem:[#allocation0] sm:$0x1] %vm9_vm1, %v8_v32   ;;  %vm105_vm1 = vcmask 523744  }
  0x78   :  { %v14_v34 = vpop.permute.xlu0 %13   ;;  %v26_v35 = vpop.permute.xlu1 %25  }
  0x79   :  { %16 = vst.msk [vmem:[#allocation0] sm:$0x1] %vm15_vm2, %v14_v34   ;;  %vm111_vm2 = vcmask 490944  }
  0x7a   :  { %22 = vst.msk [vmem:[#allocation0] sm:$0x1] %vm21_vm3, %v20_v33   ;;  %vm117_vm3 = vcmask 458144  }
  0x7b   :  { %28 = vst.msk [vmem:[#allocation0] sm:$0x1] %vm27_vm4, %v26_v35   ;;  %vm123_vm4 = vcmask 425344  }
  0x7c   :  { %v32_v36 = vpop.permute.xlu0 %31   ;;  %v38_v37 = vpop.permute.xlu1 %37  }
  0x7d   :  { %34 = vst.msk [vmem:[#allocation0] sm:$0x1] %vm33_vm5, %v32_v36   ;;  %vm129_vm5 = vcmask 392544  }
  0x7e   :  { %40 = vst.msk [vmem:[#allocation0] sm:$0x1] %vm39_vm6, %v38_v37   ;;  %vm135_vm6 = vcmask 359744  }
  0x80   :  { %v44_v38 = vpop.permute.xlu0 %43   ;;  %v50_v39 = vpop.permute.xlu1 %49  }
  0x81   :  { %46 = vst.msk [vmem:[#allocation0] sm:$0x1] %vm45_vm7, %v44_v38   ;;  %vm141_vm7 = vcmask 326944  }
  0x82   :  { %52 = vst.msk [vmem:[#allocation0] sm:$0x1] %vm51_vm8, %v50_v39   ;;  %vm147_vm8 = vcmask 294144  }
  0x84   :  { %v56_v40 = vpop.permute.xlu0 %55   ;;  %v62_v41 = vpop.permute.xlu1 %61  }
  0x85   :  { %58 = vst.msk [vmem:[#allocation0] sm:$0x1] %vm57_vm9, %v56_v40   ;;  %vm153_vm9 = vcmask 261344  }
  0x86   :  { %64 = vst.msk [vmem:[#allocation0] sm:$0x1] %vm63_vm10, %v62_v41   ;;  %vm159_vm10 = vcmask 228544  }
  0x88   :  { %v68_v42 = vpop.permute.xlu0 %67   ;;  %v74_v43 = vpop.permute.xlu1 %73  }
  0x89   :  { %70 = vst.msk [vmem:[#allocation0] sm:$0x1] %vm69_vm11, %v68_v42   ;;  %vm165_vm11 = vcmask 195744  }
  0x8a   :  { %76 = vst.msk [vmem:[#allocation0] sm:$0x1] %vm75_vm12, %v74_v43   ;;  %vm171_vm12 = vcmask 162944  }
  0x8c   :  { %v80_v44 = vpop.permute.xlu0 %79   ;;  %v86_v45 = vpop.permute.xlu1 %85  }
  0x8d   :  { %82 = vst.msk [vmem:[#allocation0] sm:$0x1] %vm81_vm13, %v80_v44   ;;  %vm177_vm13 = vcmask 130144  }
  0x8e   :  { %88 = vst.msk [vmem:[#allocation0] sm:$0x1] %vm87_vm14, %v86_v45   ;;  %vm183_vm14 = vcmask 97344  }
  0x90   :  { %v92_v46 = vpop.permute.xlu0 %91   ;;  %v98_v47 = vpop.permute.xlu1 %97  }
  0x91   :  { %94 = vst.msk [vmem:[#allocation0] sm:$0x1] %vm93_vm15, %v92_v46   ;;  %vm189_vm15 = vcmask 64544  }
  0x92   :  { %100 = vst.msk [vmem:[#allocation0] sm:$0x1] %vm99_vm0, %v98_v47  }
  0x94   :  { %v104_v48 = vpop.permute.xlu0 %103   ;;  %v110_v49 = vpop.permute.xlu1 %109  }
  0x95   :  { %106 = vst.msk [vmem:[#allocation0] sm:$0x1] %vm105_vm1, %v104_v48  }
  0x96   :  { %112 = vst.msk [vmem:[#allocation0] sm:$0x1] %vm111_vm2, %v110_v49  }
  0x98   :  { %v116_v50 = vpop.permute.xlu0 %115   ;;  %v122_v51 = vpop.permute.xlu1 %121  }
  0x99   :  { %118 = vst.msk [vmem:[#allocation0] sm:$0x1] %vm117_vm3, %v116_v50  }
  0x9a   :  { %124 = vst.msk [vmem:[#allocation0] sm:$0x1] %vm123_vm4, %v122_v51  }
  0x9c   :  { %v128_v52 = vpop.permute.xlu0 %127   ;;  %v134_v53 = vpop.permute.xlu1 %133  }
  0x9d   :  { %130 = vst.msk [vmem:[#allocation0] sm:$0x1] %vm129_vm5, %v128_v52  }
  0x9e   :  { %136 = vst.msk [vmem:[#allocation0] sm:$0x1] %vm135_vm6, %v134_v53  }
  0xa0   :  { %v140_v54 = vpop.permute.xlu0 %139   ;;  %v146_v55 = vpop.permute.xlu1 %145  }
  0xa1   :  { %142 = vst.msk [vmem:[#allocation0] sm:$0x1] %vm141_vm7, %v140_v54  }
  0xa2   :  { %148 = vst.msk [vmem:[#allocation0] sm:$0x1] %vm147_vm8, %v146_v55  }
  0xa4   :  { %v152_v56 = vpop.permute.xlu0 %151   ;;  %v158_v57 = vpop.permute.xlu1 %157  }
  0xa5   :  { %154 = vst.msk [vmem:[#allocation0] sm:$0x1] %vm153_vm9, %v152_v56  }
  0xa6   :  { %160 = vst.msk [vmem:[#allocation0] sm:$0x1] %vm159_vm10, %v158_v57  }
  0xa8   :  { %v164_v58 = vpop.permute.xlu0 %163   ;;  %v170_v59 = vpop.permute.xlu1 %169  }
  0xa9   :  { %166 = vst.msk [vmem:[#allocation0] sm:$0x1] %vm165_vm11, %v164_v58  }
  0xaa   :  { %172 = vst.msk [vmem:[#allocation0] sm:$0x1] %vm171_vm12, %v170_v59  }
  0xac   :  { %v176_v60 = vpop.permute.xlu0 %175   ;;  %v182_v61 = vpop.permute.xlu1 %181  }
  0xad   :  { %178 = vst.msk [vmem:[#allocation0] sm:$0x1] %vm177_vm13, %v176_v60  }
  0xae   :  { %184 = vst.msk [vmem:[#allocation0] sm:$0x1] %vm183_vm14, %v182_v61  }
  0xb0   :  { %v188_v62 = vpop.permute.xlu0 %187  }
  0xb1   :  { %190 = vst.msk [vmem:[#allocation0] sm:$0x1] %vm189_vm15, %v188_v62  }
  0xb8   :  { %v194_v63 = vld [vmem:[#allocation0] sm:$0x1] }
  0xb9   :  { %196 = vst [vmem:[%s400_s1] sm:$0x1] %v194_v63 }

// kernel: conv_residual_block.1
= control target key start
LH: loop header
LB: loop body
LE: loop exit
PB: predicated region body
PF: predicated region fallthrough
CT: control target
= control target key end

     0   :  { %v754_v3 = vmov 0.0   ;;  %s1131_s1 = inlined_call_operand.vmem [shape: f32[128,384], index: 1, kind: input, shape index: {}]   ;;  %s1132_s0 = inlined_call_operand.vmem [shape: f32[1,16,128], index: 0, kind: input, shape index: {}]   ;;  %s1133_s3 = inlined_call_operand.vmem [shape: f32[128,384], index: 3, kind: input, shape index: {}]   ;;  %s1134_s2 = inlined_call_operand.vmem [shape: f32[1,128], index: 2, kind: input, shape index: {}]   ;;  %s1135_s4 = inlined_call_operand.vmem [shape: f32[1,128], index: 4, kind: input, shape index: {}]   ;;  %s1136_s5 = inlined_call_operand.vmem [shape: f32[1,16,128], index: 5, kind: output, shape index: {}]  }
   0x1   :  { %v56_v0 = vld [vmem:[%s1131_s1 + $0x8] sm:$0xff]  ;;  %v59_v1 = vld [vmem:[%s1131_s1 + $0x20] sm:$0xff]  ;;  %167 = vmatprep.mubr.f32.mxu0 %v754_v3  ;;  %v58_v5 = vld [vmem:[%s1131_s1 + $0x18] sm:$0xff] }
   0x2   :  { %v55_v2 = vld [vmem:[%s1131_s1] sm:$0xff]  ;;  %v625_v4 = vpack.c.bf16 %v59_v1, %v56_v0  ;;  %v62_v6 = vld [vmem:[%s1131_s1 + $0x38] sm:$0xff]  ;;  %v65_v7 = vld [vmem:[%s1131_s1 + $0x50] sm:$0xff] }
   0x3   :  { %v627_v8 = vpack.c.bf16 %v58_v5, %v55_v2  ;;  %v629_v9 = vpack.c.bf16 %v65_v7, %v62_v6  ;;  %v57_v10 = vld [vmem:[%s1131_s1 + $0x10] sm:$0xff]  ;;  %v60_v11 = vld [vmem:[%s1131_s1 + $0x28] sm:$0xff]  ;;  %v71_v16 = vld [vmem:[%s1131_s1 + $0x80] sm:$0xff] }
   0x4   :  { %v61_v12 = vld [vmem:[%s1131_s1 + $0x30] sm:$0xff]  ;;  %626 = vmatprep.subr.bf16.mxu0 %v625_v4  ;;  %v657_v13 = vpack.c.bf16 %v60_v11, %v57_v10  ;;  %v64_v14 = vld [vmem:[%s1131_s1 + $0x48] sm:$0xff]  ;;  %v63_v18 = vld [vmem:[%s1131_s1 + $0x40] sm:$0xff] }
   0x5   :  { %v68_v15 = vld [vmem:[%s1131_s1 + $0x68] sm:$0xff]  ;;  %628 = vmatpush1.bf16.msra.mxu0 %v627_v8  ;;  %v631_v17 = vpack.c.bf16 %v64_v14, %v61_v12  ;;  %v66_v19 = vld [vmem:[%s1131_s1 + $0x58] sm:$0xff]  ;;  %v67_v22 = vld [vmem:[%s1131_s1 + $0x60] sm:$0xff] }
   0x6   :  { %630 = vmatprep.subr.bf16.mxu0 %v629_v9  ;;  %658 = vmatprep.subr.bf16.mxu1 %v657_v13  ;;  %v633_v20 = vpack.c.bf16 %v71_v16, %v68_v15  ;;  %v661_v21 = vpack.c.bf16 %v66_v19, %v63_v18  ;;  %v70_v23 = vld [vmem:[%s1131_s1 + $0x78] sm:$0xff]  ;;  %v77_v25 = vld [vmem:[%s1131_s1 + $0xb0] sm:$0xff]  ;;  %v72_v27 = vld [vmem:[%s1131_s1 + $0x88] sm:$0xff] }
   0x7   :  { %v74_v24 = vld [vmem:[%s1131_s1 + $0x98] sm:$0xff]  ;;  %660 = vmatpush3.bf16.msra.mxu1 %v657_v13  ;;  %v69_v26 = vld [vmem:[%s1131_s1 + $0x70] sm:$0xff]  ;;  %v635_v29 = vpack.c.bf16 %v70_v23, %v67_v22  ;;  %v75_v30 = vld [vmem:[%s1131_s1 + $0xa0] sm:$0xff] }
   0x8   :  { %662 = vmatprep.subr.bf16.mxu1 %v661_v21  ;;  %v665_v28 = vpack.c.bf16 %v72_v27, %v69_v26  ;;  %v78_v31 = vld [vmem:[%s1131_s1 + $0xb8] sm:$0xff]  ;;  %v637_v32 = vpack.c.bf16 %v77_v25, %v74_v24  ;;  %v73_v33 = vld [vmem:[%s1131_s1 + $0x90] sm:$0xff]  ;;  %v76_v34 = vld [vmem:[%s1131_s1 + $0xa8] sm:$0xff] }
   0x9   :  { %632 = vmatpush1.bf16.msra.mxu0 %v631_v17  ;;  %v80_v35 = vld [vmem:[%s1131_s1 + $0xc8] sm:$0xff]  ;;  %v83_v36 = vld [vmem:[%s1131_s1 + $0xe0] sm:$0xff]  ;;  %v669_v37 = vpack.c.bf16 %v78_v31, %v75_v30  ;;  %v639_v38 = vpack.c.bf16 %v76_v34, %v73_v33  ;;  %v81_v39 = vld [vmem:[%s1131_s1 + $0xd0] sm:$0xff] }
   0xa   :  { %634 = vmatprep.subr.bf16.mxu0 %v633_v20  ;;  %v84_v40 = vld [vmem:[%s1131_s1 + $0xe8] sm:$0xff]  ;;  %v641_v41 = vpack.c.bf16 %v83_v36, %v80_v35  ;;  %v79_v42 = vld [vmem:[%s1131_s1 + $0xc0] sm:$0xff]  ;;  %v82_v43 = vld [vmem:[%s1131_s1 + $0xd8] sm:$0xff] }
   0xb   :  { %664 = vmatpush3.bf16.msra.mxu1 %v661_v21  ;;  %v86_v44 = vld [vmem:[%s1131_s1 + $0xf8] sm:$0xff]  ;;  %v89_v45 = vld [vmem:[%s1131_s1 + $0x110] sm:$0xff]  ;;  %v673_v46 = vpack.c.bf16 %v84_v40, %v81_v39  ;;  %v885_v47 = vld [vmem:[%s1132_s0] sm:$0xff]  ;;  %v643_v48 = vpack.c.bf16 %v82_v43, %v79_v42 }
   0xc   :  { %666 = vmatprep.subr.bf16.mxu1 %v665_v28  ;;  %v87_v49 = vld [vmem:[%s1131_s1 + $0x100] sm:$0xff]  ;;  %v90_v50 = vld [vmem:[%s1131_s1 + $0x118] sm:$0xff]  ;;  %v53_v51 = vmax.f32 %v885_v47, 0.0  ;;  %v645_v52 = vpack.c.bf16 %v89_v45, %v86_v44  ;;  %v85_v53 = vld [vmem:[%s1131_s1 + $0xf0] sm:$0xff] }
   0xd   :  { %636 = vmatpush1.bf16.msra.mxu0 %v635_v29  ;;  %v88_v54 = vld [vmem:[%s1131_s1 + $0x108] sm:$0xff]  ;;  %v95_v56 = vld [vmem:[%s1131_s1 + $0x140] sm:$0xff]  ;;  %v677_v57 = vpack.c.bf16 %v90_v50, %v87_v49  ;;  %v93_v59 = vld [vmem:[%s1131_s1 + $0x130] sm:$0xff] }
   0xe   :  { %638 = vmatprep.subr.bf16.mxu0 %v637_v32  ;;  %v92_v55 = vld [vmem:[%s1131_s1 + $0x128] sm:$0xff]  ;;  %587 = vmatprep.mubr.f32.mxu1 %v53_v51  ;;  %v647_v58 = vpack.c.bf16 %v88_v54, %v85_v53  ;;  %v91_v62 = vld [vmem:[%s1131_s1 + $0x120] sm:$0xff]  ;;  %v94_v63 = vld [vmem:[%s1131_s1 + $0x138] sm:$0xff] }
   0xf   :  { %668 = vmatpush3.bf16.msra.mxu1 %v665_v28  ;;  %v96_v60 = vld [vmem:[%s1131_s1 + $0x148] sm:$0xff]  ;;  %v649_v61 = vpack.c.bf16 %v95_v56, %v92_v55  ;;  %v98_v0 = vld [vmem:[%s1131_s1 + $0x158] sm:$0xff]  ;;  %v101_v1 = vld [vmem:[%s1131_s1 + $0x170] sm:$0xff]  ;;  %v651_v4 = vpack.c.bf16 %v94_v63, %v91_v62 }
  0x10   :  { %670 = vmatprep.subr.bf16.mxu1 %v669_v37  ;;  %v681_v2 = vpack.c.bf16 %v96_v60, %v93_v59  ;;  %v99_v5 = vld [vmem:[%s1131_s1 + $0x160] sm:$0xff]  ;;  %v102_v6 = vld [vmem:[%s1131_s1 + $0x178] sm:$0xff]  ;;  %v653_v7 = vpack.c.bf16 %v101_v1, %v98_v0  ;;  %v97_v8 = vld [vmem:[%s1131_s1 + $0x150] sm:$0xff] }
  0x11   :  { %640 = vmatpush1.bf16.msra.mxu0 %v639_v38  ;;  %v100_v9 = vld [vmem:[%s1131_s1 + $0x168] sm:$0xff]  ;;  %v288_v11 = vld [vmem:[%s1133_s3 + $0x20] sm:$0xff]  ;;  %v685_v12 = vpack.c.bf16 %v102_v6, %v99_v5  ;;  %v286_v14 = vld [vmem:[%s1133_s3 + $0x10] sm:$0xff] }
  0x12   :  { %642 = vmatprep.subr.bf16.mxu0 %v641_v41  ;;  %v285_v10 = vld [vmem:[%s1133_s3 + $0x8] sm:$0xff]  ;;  %v655_v13 = vpack.c.bf16 %v100_v9, %v97_v8  ;;  %v284_v17 = vld [vmem:[%s1133_s3] sm:$0xff]  ;;  %v287_v18 = vld [vmem:[%s1133_s3 + $0x18] sm:$0xff] }
  0x13   :  { %672 = vmatpush3.bf16.msra.mxu1 %v669_v37  ;;  %v289_v15 = vld [vmem:[%s1133_s3 + $0x28] sm:$0xff]  ;;  %v689_v16 = vpack.c.bf16 %v288_v11, %v285_v10  ;;  %v291_v20 = vld [vmem:[%s1133_s3 + $0x38] sm:$0xff]  ;;  %v294_v21 = vld [vmem:[%s1133_s3 + $0x50] sm:$0xff]  ;;  %v691_v23 = vpack.c.bf16 %v287_v18, %v284_v17 }
  0x14   :  { %674 = vmatprep.subr.bf16.mxu1 %v673_v46  ;;  %v959_v19 = vld [vmem:[%s1132_s0 + $0x8] sm:$0xff]  ;;  %v721_v22 = vpack.c.bf16 %v289_v15, %v286_v14  ;;  %v292_v24 = vld [vmem:[%s1133_s3 + $0x40] sm:$0xff]  ;;  %v295_v25 = vld [vmem:[%s1133_s3 + $0x58] sm:$0xff]  ;;  %v693_v27 = vpack.c.bf16 %v294_v21, %v291_v20 }
  0x15   :  { %644 = vmatpush1.bf16.msra.mxu0 %v643_v48  ;;  %v54_v26 = vmax.f32 %v959_v19, 0.0  ;;  %v290_v28 = vld [vmem:[%s1133_s3 + $0x30] sm:$0xff]  ;;  %v293_v29 = vld [vmem:[%s1133_s3 + $0x48] sm:$0xff]  ;;  %v300_v31 = vld [vmem:[%s1133_s3 + $0x80] sm:$0xff]  ;;  %v725_v32 = vpack.c.bf16 %v295_v25, %v292_v24  ;;  %v22_v25 = vlaneseq }
  0x16   :  { %646 = vmatprep.subr.bf16.mxu0 %v645_v52  ;;  %v297_v30 = vld [vmem:[%s1133_s3 + $0x68] sm:$0xff]  ;;  %v695_v33 = vpack.c.bf16 %v293_v29, %v290_v28  ;;  %v298_v34 = vld [vmem:[%s1133_s3 + $0x70] sm:$0xff]  ;;  %v296_v37 = vld [vmem:[%s1133_s3 + $0x60] sm:$0xff] }
  0x17   :  { %676 = vmatpush3.bf16.msra.mxu1 %v673_v46  ;;  %v301_v35 = vld [vmem:[%s1133_s3 + $0x88] sm:$0xff]  ;;  %v697_v36 = vpack.c.bf16 %v300_v31, %v297_v30  ;;  %v299_v38 = vld [vmem:[%s1133_s3 + $0x78] sm:$0xff]  ;;  %v306_v40 = vld [vmem:[%s1133_s3 + $0xb0] sm:$0xff] }
  0x18   :  { %678 = vmatprep.subr.bf16.mxu1 %v677_v57  ;;  %v303_v39 = vld [vmem:[%s1133_s3 + $0x98] sm:$0xff]  ;;  %v729_v41 = vpack.c.bf16 %v301_v35, %v298_v34  ;;  %v699_v42 = vpack.c.bf16 %v299_v38, %v296_v37  ;;  %v304_v43 = vld [vmem:[%s1133_s3 + $0xa0] sm:$0xff]  ;;  %v302_v46 = vld [vmem:[%s1133_s3 + $0x90] sm:$0xff] }
  0x19   :  { %648 = vmatpush1.bf16.msra.mxu0 %v647_v58  ;;  %v307_v44 = vld [vmem:[%s1133_s3 + $0xb8] sm:$0xff]  ;;  %v701_v45 = vpack.c.bf16 %v306_v40, %v303_v39  ;;  %v305_v48 = vld [vmem:[%s1133_s3 + $0xa8] sm:$0xff]  ;;  %v312_v52 = vld [vmem:[%s1133_s3 + $0xe0] sm:$0xff] }
  0x1a   :  { %650 = vmatprep.subr.bf16.mxu0 %v649_v61  ;;  %v733_v49 = vpack.c.bf16 %v307_v44, %v304_v43  ;;  %v703_v50 = vpack.c.bf16 %v305_v48, %v302_v46  ;;  %v308_v54 = vld [vmem:[%s1133_s3 + $0xc0] sm:$0xff]  ;;  %v311_v55 = vld [vmem:[%s1133_s3 + $0xd8] sm:$0xff]  ;;  %v310_v56 = vld [vmem:[%s1133_s3 + $0xd0] sm:$0xff] }
  0x1b   :  { %680 = vmatpush3.bf16.msra.mxu1 %v677_v57  ;;  %v707_v57 = vpack.c.bf16 %v311_v55, %v308_v54  ;;  %v313_v58 = vld [vmem:[%s1133_s3 + $0xe8] sm:$0xff]  ;;  %v315_v60 = vld [vmem:[%s1133_s3 + $0xf8] sm:$0xff]  ;;  %v318_v61 = vld [vmem:[%s1133_s3 + $0x110] sm:$0xff] }
  0x1c   :  { %682 = vmatprep.subr.bf16.mxu1 %v681_v2  ;;  %v737_v59 = vpack.c.bf16 %v313_v58, %v310_v56  ;;  %v709_v62 = vpack.c.bf16 %v318_v61, %v315_v60  ;;  %v314_v63 = vld [vmem:[%s1133_s3 + $0xf0] sm:$0xff]  ;;  %v317_v0 = vld [vmem:[%s1133_s3 + $0x108] sm:$0xff]  ;;  %v316_v1 = vld [vmem:[%s1133_s3 + $0x100] sm:$0xff] }
  0x1d   :  { %652 = vmatpush1.bf16.msra.mxu0 %v651_v4  ;;  %v319_v4 = vld [vmem:[%s1133_s3 + $0x118] sm:$0xff]  ;;  %v321_v6 = vld [vmem:[%s1133_s3 + $0x128] sm:$0xff]  ;;  %v320_v9 = vld [vmem:[%s1133_s3 + $0x120] sm:$0xff] }
  0x1e   :  { %654 = vmatprep.subr.bf16.mxu0 %v653_v7  ;;  %v741_v5 = vpack.c.bf16 %v319_v4, %v316_v1  ;;  %v324_v7 = vld [vmem:[%s1133_s3 + $0x140] sm:$0xff]  ;;  %v323_v10 = vld [vmem:[%s1133_s3 + $0x138] sm:$0xff]  ;;  %v322_v11 = vld [vmem:[%s1133_s3 + $0x130] sm:$0xff] }
  0x1f   :  { %684 = vmatpush3.bf16.msra.mxu1 %v681_v2  ;;  %v711_v2 = vpack.c.bf16 %v317_v0, %v314_v63  ;;  %v713_v8 = vpack.c.bf16 %v324_v7, %v321_v6  ;;  %v327_v15 = vld [vmem:[%s1133_s3 + $0x158] sm:$0xff]  ;;  %v326_v18 = vld [vmem:[%s1133_s3 + $0x150] sm:$0xff]  ;;  %v329_v20 = vld [vmem:[%s1133_s3 + $0x168] sm:$0xff] }
  0x20   :  { %686 = vmatprep.subr.bf16.mxu1 %v685_v12  ;;  %v719_v21 = vpack.c.bf16 %v329_v20, %v326_v18 }
  0x21   :  { %656 = vmatpush1.bf16.msra.mxu0 %v655_v13  ;;  %v325_v13 = vld [vmem:[%s1133_s3 + $0x148] sm:$0xff] }
  0x22   :  { %690 = vmatprep.subr.bf16.mxu0 %v689_v16  ;;  %v745_v14 = vpack.c.bf16 %v325_v13, %v322_v11  ;;  %v330_v16 = vld [vmem:[%s1133_s3 + $0x170] sm:$0xff] }
  0x23   :  { %688 = vmatpush3.bf16.msra.mxu1 %v685_v12  ;;  %v715_v12 = vpack.c.bf16 %v323_v10, %v320_v9  ;;  %v717_v17 = vpack.c.bf16 %v330_v16, %v327_v15 }
  0x24   :  { %168 = vmatmul.mubr.f32.vlgmr.msra.gmra.mrb[0].mxu0 %v53_v51  ;;  %722 = vmatprep.subr.bf16.mxu1 %v721_v22  ;;  %v309_v51 = vld [vmem:[%s1133_s3 + $0xc8] sm:$0xff] }
  0x25   :  { %173 = vmatprep.mubr.f32.mxu0 %v754_v3  ;;  %692 = vmatpush1.bf16.msra.mxu0 %v691_v23  ;;  %v705_v53 = vpack.c.bf16 %v312_v52, %v309_v51  ;;  %v331_v23 = vld [vmem:[%s1133_s3 + $0x178] sm:$0xff]  ;;  %v517_v51 = vld [vmem:[%s1134_s2] ss:$0 sm:$0xff] }
  0x26   :  { %588 = vmatmul.mubr.f32.vlgmr.msra.gmra.mrb[0].mxu1 %v54_v26  ;;  %694 = vmatprep.subr.bf16.mxu0 %v693_v27 }
  0x27   :  { %724 = vmatpush3.bf16.msra.mxu1 %v721_v22  ;;  %v328_v22 = vld [vmem:[%s1133_s3 + $0x160] sm:$0xff] }
  0x28   :  { %174 = vmatmul.mubr.f32.gmra.mrb[2].mxu0 %v54_v26  ;;  %726 = vmatprep.subr.bf16.mxu1 %v725_v32  ;;  %v749_v24 = vpack.c.bf16 %v331_v23, %v328_v22  ;;  %v23_v26 = vshrl.u32 %v22_v25, 7 }
  0x29   :  { %696 = vmatpush1.bf16.msra.mxu0 %v695_v33  ;;  %396 = vmatprep.mubr.f32.mxu0 %v754_v3 }
  0x2a   :  { %698 = vmatprep.subr.bf16.mxu0 %v697_v36  ;;  %v24_v27 = vadd.s32 8, %v23_v26  ;;  %v29_v31 = vand.u32 15, %v23_v26  ;;  %vm266_vm0 = vcmp.lt.s32.totalorder %v23_v26, 7  ;;  %vm257_vm1 = vcmp.lt.s32.totalorder %v23_v26, 1 }
  0x2b   :  { %728 = vmatpush3.bf16.msra.mxu1 %v725_v32 }
  0x2c   :  { %730 = vmatprep.subr.bf16.mxu1 %v729_v41  ;;  %v36_v29 = vand.u32 15, %v24_v27  ;;  %vm1096_vm3 = vcmp.ne.s32.totalorder %v29_v31, 0 }
  0x2d   :  { %700 = vmatpush1.bf16.msra.mxu0 %v699_v42 }
  0x2e   :  { %702 = vmatprep.subr.bf16.mxu0 %v701_v45  ;;  %vm1092_vm2 = vcmp.ne.s32.totalorder %v36_v29, 15 }
  0x2f   :  { %732 = vmatpush3.bf16.msra.mxu1 %v729_v41 }
  0x30   :  { %734 = vmatprep.subr.bf16.mxu1 %v733_v49 }
  0x31   :  { %704 = vmatpush1.bf16.msra.mxu0 %v703_v50 }
  0x32   :  { %706 = vmatprep.subr.bf16.mxu0 %v705_v53 }
  0x33   :  { %736 = vmatpush3.bf16.msra.mxu1 %v733_v49 }
  0x34   :  { %738 = vmatprep.subr.bf16.mxu1 %v737_v59 }
  0x35   :  { %708 = vmatpush1.bf16.msra.mxu0 %v707_v57 }
  0x36   :  { %710 = vmatprep.subr.bf16.mxu0 %v709_v62 }
  0x37   :  { %740 = vmatpush3.bf16.msra.mxu1 %v737_v59 }
  0x38   :  { %742 = vmatprep.subr.bf16.mxu1 %v741_v5 }
  0x39   :  { %712 = vmatpush1.bf16.msra.mxu0 %v711_v2 }
  0x3a   :  { %714 = vmatprep.subr.bf16.mxu0 %v713_v8 }
  0x3b   :  { %744 = vmatpush3.bf16.msra.mxu1 %v741_v5 }
  0x3c   :  { %746 = vmatprep.subr.bf16.mxu1 %v745_v14 }
  0x3d   :  { %716 = vmatpush1.bf16.msra.mxu0 %v715_v12  ;;  %v518_v12 = vld [vmem:[%s1135_s4] ss:$0 sm:$0xff] }
  0x3e   :  { %718 = vmatprep.subr.bf16.mxu0 %v717_v17 }
  0x3f   :  { %748 = vmatpush3.bf16.msra.mxu1 %v745_v14 }
  0x40   :  { %750 = vmatprep.subr.bf16.mxu1 %v749_v24 }
  0x41   :  { %720 = vmatpush1.bf16.msra.mxu0 %v719_v21 }
  0x43   :  { %752 = vmatpush3.bf16.msra.mxu1 %v749_v24 }
  0xf7   :  { %v169_v28 = vpop.f32.mrb[0].mxu0 }
  0xf8   :  { %v171_v30 = vpop.f32.mrb[1].mxu0  ;;  %v255_v38 = vrot.slane %v169_v28, 7 }
  0xf9   :  { %v589_v32 = vpop.f32.mrb[0].mxu1 }
  0xfa   :  { %v265_v33 = vrot.slane %v589_v32, 1  ;;  %v246_v34 = vpop.f32.mrb[1].mxu1 }
  0xfb   :  { %v175_v35 = vpop.f32.mrb[2].mxu0  ;;  %v264_v37 = vrot.slane %v246_v34, 1 }
  0xfc   :  { %v256_v40 = vrot.slane %v175_v35, 7  ;;  %v177_v41 = vpop.f32.mrb[3].mxu0 }
  0xfd   :  { %v267_v42 = vsel %vm266_vm0, %v264_v37, %v265_v33  ;;  %v268_v43 = vsel %vm266_vm0, %v265_v33, %v264_v37 }
  0xfe   :  { %v259_v44 = vsel %vm257_vm1, %v256_v40, %v255_v38  ;;  %v258_v45 = vsel %vm257_vm1, %v255_v38, %v256_v40  ;;  %v270_v46 = vsel %vm1092_vm2, %v268_v43, 0.0 }
  0xff   :  { %v260_v48 = vsel %vm1096_vm3, %v259_v44, 0.0  ;;  %v263_v49 = vadd.f32 %v258_v45, %v177_v41 }
 0x100   :  { %v262_v50 = vadd.f32 %v260_v48, %v171_v30 }
 0x101   :  { %v272_v52 = vadd.f32 %v270_v46, %v263_v49 }
 0x102   :  { %v271_v53 = vadd.f32 %v267_v42, %v262_v50 }
 0x103   :  { %v281_v54 = vadd.f32 %v517_v51, %v272_v52 }
 0x104   :  { %v280_v55 = vadd.f32 %v517_v51, %v271_v53 }
 0x105   :  { %v283_v57 = vmax.f32 %v281_v54, 0.0 }
 0x106   :  { %v282_v56 = vmax.f32 %v280_v55, 0.0 }
 0x108   :  { %397 = vmatmul.mubr.f32.vlgmr.msra.gmra.mrb[4].mxu0 %v282_v56  ;;  %622 = vmatprep.mubr.f32.mxu1 %v282_v56 }
 0x109   :  { %623 = vmatmul.mubr.f32.vlgmr.msra.gmra.mrb[2].mxu1 %v283_v57  ;;  %402 = vmatprep.mubr.f32.mxu0 %v754_v3 }
 0x10c   :  { %403 = vmatmul.mubr.f32.gmra.mrb[6].mxu0 %v283_v57 }
 0x1db   :  { %v398_v58 = vpop.f32.mrb[4].mxu0 }
 0x1dc   :  { %v400_v59 = vpop.f32.mrb[5].mxu0  ;;  %v624_v60 = vpop.f32.mrb[2].mxu1  ;;  %v484_v1 = vrot.slane %v398_v58, 7 }
 0x1dd   :  { %v493_v61 = vrot.slane %v624_v60, 1  ;;  %v475_v62 = vpop.f32.mrb[3].mxu1 }
 0x1de   :  { %v492_v63 = vrot.slane %v475_v62, 1 }
 0x1df   :  { %v404_v0 = vpop.f32.mrb[6].mxu0 }
 0x1e0   :  { %v494_v2 = vsel %vm266_vm0, %v492_v63, %v493_v61  ;;  %v495_v4 = vsel %vm266_vm0, %v493_v61, %v492_v63  ;;  %v485_v5 = vrot.slane %v404_v0, 7  ;;  %v406_v6 = vpop.f32.mrb[7].mxu0 }
 0x1e1   :  { %v497_v11 = vsel %vm1092_vm2, %v495_v4, 0.0 }
 0x1e2   :  { %v487_v7 = vsel %vm257_vm1, %v485_v5, %v484_v1  ;;  %v486_v8 = vsel %vm257_vm1, %v484_v1, %v485_v5 }
 0x1e3   :  { %v488_v3 = vsel %vm1096_vm3, %v487_v7, 0.0  ;;  %v491_v9 = vadd.f32 %v486_v8, %v406_v6 }
 0x1e4   :  { %v490_v10 = vadd.f32 %v488_v3, %v400_v59 }
 0x1e5   :  { %v499_v13 = vadd.f32 %v497_v11, %v491_v9 }
 0x1e6   :  { %v498_v14 = vadd.f32 %v494_v2, %v490_v10 }
 0x1e7   :  { %v508_v15 = vadd.f32 %v518_v12, %v499_v13 }
 0x1e8   :  { %v507_v16 = vadd.f32 %v518_v12, %v498_v14 }
 0x1e9   :  { %v510_v17 = vadd.f32 %v508_v15, %v959_v19 }
 0x1ea   :  { %v509_v18 = vadd.f32 %v507_v16, %v885_v47 }
 0x1eb   :  { %512 = vst [vmem:[%s1136_s5 + $0x8] sm:$0xff] %v510_v17 }
 0x1ec   :  { %511 = vst [vmem:[%s1136_s5] sm:$0xff] %v509_v18 }

</bundles_post_ra>
